<compile_context>
chip_gen: v6e
topology: v6e:2x2x1
jax: 0.10.0
libtpu: 0.0.40
codegen_flags: <defaults>
</compile_context>

<pallas_src>
import functools
import math

import numpy as np
import jax
import jax.numpy as jnp
from jax.experimental import pallas as pl
from jax.experimental.pallas import tpu as pltpu

BF16 = jnp.bfloat16
F32 = jnp.float32


# ----------------------------------------------------------------------------------
# Rank-2 decomposition of the Transformer-XL style positional table (cached, host-side).
#   R[d,a,b] = Aq[a,d]*Bk[b,d] + Cq[a,d]*Dk[b,d]   (angle-sum identities)
# ----------------------------------------------------------------------------------
@functools.lru_cache(maxsize=None)
def build_pos_tables(head_dim, sq, sk):
    d = np.arange(head_dim)
    freq = 10000.0 ** (-2.0 * (d // 2).astype(np.float32) / head_dim)   # (hd,)
    even = (d % 2 == 0)[None, :]
    tq = np.arange(sq, dtype=np.float32)[:, None] * freq[None, :]       # (sq, hd)
    tk = np.arange(sk, dtype=np.float32)[:, None] * freq[None, :]       # (sk, hd)
    aq = np.where(even, np.sin(tq), np.cos(tq)).astype(np.float32)
    cq = np.where(even, -np.cos(tq), np.sin(tq)).astype(np.float32)
    # Packed lane-dense positional RHS half: [bk | dk] = [cos | sin]  (sk, 2*hd).
    bkdk = np.concatenate([np.cos(tk), np.sin(tk)], axis=1).astype(np.float32)
    return aq, cq, bkdk


def _pick_tile(n, target=256):
    """Largest multiple-of-8 tile <= min(target, n//2) that divides n (so the grid has
    >=2 steps whenever n allows it -> both v7x TensorCores usable); else full extent."""
    if n <= 8 or n % 8 != 0:
        return n
    t = min(target, n // 2)
    t -= t % 8
    while t >= 8:
        if n % t == 0:
            return t
        t -= 8
    return n


def _vmem_limit(est_bytes, floor=32 << 20, cap=64 << 20):
    """Explicit scoped-VMEM limit: estimate * 1.5 headroom, clamped to [32, 64] MiB."""
    return int(max(floor, min(cap, est_bytes * 3 // 2)))


# ----------------------------------------------------------------------------------
# Kernel 1: K / V projections (full-width bf16 GEMMs, gridded over Sk),
#           emitted HEAD-MAJOR (heads, Sk, hd) so kernel 2 never lane-slices K/V.
# ----------------------------------------------------------------------------------
def _kv_proj_kernel(key_ref, value_ref, wkT_ref, wvT_ref, k_out_ref, v_out_ref,
                    *, heads, head_dim):
    nn = (((1,), (0,)), ((), ()))
    k = jax.lax.dot_general(key_ref[...].astype(BF16), wkT_ref[...], nn,
                            preferred_element_type=F32)
    v = jax.lax.dot_general(value_ref[...].astype(BF16), wvT_ref[...], nn,
                            preferred_element_type=F32)
    for h in range(heads):
        sl = slice(h * head_dim, (h + 1) * head_dim)
        k_out_ref[h, :, :] = k[:, sl].astype(BF16)
        v_out_ref[h, :, :] = v[:, sl].astype(BF16)


# ----------------------------------------------------------------------------------
# Kernel 2: attention + output projection + LN + FFN + LN, gridded over Sq tiles.
# ----------------------------------------------------------------------------------
def _block_kernel(
    q_in_ref, k_ref, v_ref, aq_ref, cq_ref, bkdk_ref,
    wqT_ref, u_ref, vbias_ref, woT_ref, bo_ref, g0_ref, beta0_ref,
    w1T_ref, b1_ref, w2T_ref, b2_ref, g1_ref, beta1_ref,
    out_ref, lhs_scr, rhs_scr, cat_scr, *, heads, head_dim,
):
    nn = (((1,), (0,)), ((), ()))   # A @ B
    nt = (((1,), (1,)), ((), ()))   # A @ B.T
    hd = head_dim

    q_in = q_in_ref[...]                                              # (TQ, D) f32
    # Full-width Q projection on the MXU (pre-transposed bf16 weight).
    q_all = jax.lax.dot_general(q_in.astype(BF16), wqT_ref[...], nn,
                                preferred_element_type=F32)           # (TQ, D) f32
    aq = aq_ref[...]                                                  # (TQ, hd) f32
    cq = cq_ref[...]                                                  # (TQ, hd) f32

    # Positional half of the fused-score RHS is head-independent: write it once per tile.
    rhs_scr[:, : 2 * hd] = bkdk_ref[...]                              # [bk | dk] bf16

    scale = hd ** -0.5
    for h in range(heads):
        sl = slice(h * hd, (h + 1) * hd)
        q_h = q_all[:, sl]                                            # (TQ, hd) f32
        u_row = u_ref[h:h + 1, :]                                     # (1, hd) f32
        w_row = vbias_ref[h:h + 1, :]                                 # (1, hd) f32

        # Fold the 1/sqrt(hd) scale into the small (TQ, hd) LHS operands.
        qu = ((q_h + u_row) * scale).astype(BF16)                     # content + u-bias
        qv = (q_h + w_row) * scale                                    # positional (f32)

        # Assemble fused LHS = [qva | qvc | qu] and RHS = [bk | dk | k_h]:
        lhs_scr[:, :hd] = (qv * aq).astype(BF16)
        lhs_scr[:, hd:2 * hd] = (qv * cq).astype(BF16)
        lhs_scr[:, 2 * hd:] = qu
        rhs_scr[:, 2 * hd:] = k_ref[h]                                # (Sk, hd) bf16

        # ONE MXU matmul with contraction 3*hd covers all four score terms.
        scores = jax.lax.dot_general(lhs_scr[...], rhs_scr[...], nt,
                                     preferred_element_type=F32)      # (TQ, Sk) f32

        # Softmax with deferred normalization: matmul the unnormalized e into V first,
        # then scale the small (TQ, hd) result by an exact 1/sum.
        m = jnp.max(scores, axis=-1, keepdims=True)
        e = jnp.exp(scores - m)
        l = jnp.sum(e, axis=-1, keepdims=True)
        head_out = jax.lax.dot_general(e.astype(BF16), v_ref[h], nn,
                                       preferred_element_type=F32)    # (TQ, hd) f32
        head_out = head_out * (1.0 / l)

        # Concat (head-blocked columns) for the single full-width output projection.
        cat_scr[:, sl] = head_out.astype(BF16)

    # One (TQ, D) @ (D, D) output projection (contraction = D, full MXU depth).
    attn = jax.lax.dot_general(cat_scr[...], woT_ref[...], nn,
                               preferred_element_type=F32) + bo_ref[...]

    def layernorm(x, g, b, eps=1e-5):
        mu = jnp.mean(x, axis=-1, keepdims=True)
        var = jnp.mean((x - mu) ** 2, axis=-1, keepdims=True)
        return (x - mu) * jax.lax.rsqrt(var + eps) * g + b

    x = layernorm(attn + q_in, g0_ref[...], beta0_ref[...])

    h1 = jax.lax.dot_general(x.astype(BF16), w1T_ref[...], nn,
                             preferred_element_type=F32) + b1_ref[...]
    h1 = jnp.where(h1 > 0, h1, jnp.exp(jnp.minimum(h1, 0.0)) - 1.0)   # ELU (f32)
    h2 = jax.lax.dot_general(h1.astype(BF16), w2T_ref[...], nn,
                             preferred_element_type=F32) + b2_ref[...]

    out_ref[...] = layernorm(h2 + x, g1_ref[...], beta1_ref[...])


# ----------------------------------------------------------------------------------
# Wrapper
# ----------------------------------------------------------------------------------
def prepare_params(p):
    """One-time (outside jit): pre-transpose matmul weights and cast them to bf16."""
    return dict(
        wqT=p["wq"].T.astype(BF16), wkT=p["wk"].T.astype(BF16),
        wvT=p["wv"].T.astype(BF16), woT=p["wo"].T.astype(BF16),
        w1T=p["w1"].T.astype(BF16), w2T=p["w2"].T.astype(BF16),
        u=p["u"], v=p["v"], bo=p["bo"],
        g0=p["g0"], beta0=p["beta0"], b1=p["b1"], b2=p["b2"],
        g1=p["g1"], beta1=p["beta1"],
    )


def transformer_block(value, key, query, params, *, heads, head_dim, tile_q=None):
    sq, model_dim = query.shape
    sk = key.shape[0]
    ffn_dim = params["w1T"].shape[1]
    hd = head_dim

    aq_np, cq_np, bkdk_np = build_pos_tables(hd, sq, sk)
    aq = jnp.asarray(aq_np)                       # (sq, hd) f32
    cq = jnp.asarray(cq_np)                       # (sq, hd) f32
    bkdk = jnp.asarray(bkdk_np, dtype=BF16)       # (sk, 2*hd) bf16, packed on host

    # ---- kernel 1: project K / V once, head-major, reused by every Q tile ----
    tile_k = _pick_tile(sk)
    kv_row = lambda i: (i, 0)
    kv_full = lambda i: (0, 0)
    kv_out = lambda i: (0, i, 0)
    est1 = (4 * tile_k * model_dim * 4            # key + value f32 tiles (double-buffered)
            + 4 * model_dim * model_dim * 2       # WkT + WvT bf16 (double-buffered)
            + 4 * tile_k * model_dim * 2          # K / V bf16 out tiles (double-buffered)
            + 2 * tile_k * model_dim * 4)         # f32 intermediates
    k_proj, v_proj = pl.pallas_call(
        functools.partial(_kv_proj_kernel, heads=heads, head_dim=hd),
        out_shape=(jax.ShapeDtypeStruct((heads, sk, hd), BF16),
                   jax.ShapeDtypeStruct((heads, sk, hd), BF16)),
        grid_spec=pltpu.PrefetchScalarGridSpec(
            num_scalar_prefetch=0, grid=(sk // tile_k,),
            in_specs=[pl.BlockSpec((tile_k, model_dim), kv_row),
                      pl.BlockSpec((tile_k, model_dim), kv_row),
                      pl.BlockSpec((model_dim, model_dim), kv_full),
                      pl.BlockSpec((model_dim, model_dim), kv_full)],
            out_specs=(pl.BlockSpec((heads, tile_k, hd), kv_out),
                       pl.BlockSpec((heads, tile_k, hd), kv_out))),
        compiler_params=pltpu.CompilerParams(
            dimension_semantics=("parallel",),
            vmem_limit_bytes=_vmem_limit(est1)),
    )(key, value, params["wkT"], params["wvT"])

    # ---- kernel 2: fused attention + FFN, gridded over Sq tiles ----
    if tile_q is None:
        tile_q = _pick_tile(sq)
    q_map = lambda i: (i, 0)
    full = lambda i: (0, 0)
    full3 = lambda i: (0, 0, 0)

    in_specs = [
        pl.BlockSpec((tile_q, model_dim), q_map),     # query tile
        pl.BlockSpec((heads, sk, hd), full3),         # K (bf16, head-major, pre-projected)
        pl.BlockSpec((heads, sk, hd), full3),         # V
        pl.BlockSpec((tile_q, hd), q_map),            # Aq (f32)
        pl.BlockSpec((tile_q, hd), q_map),            # Cq (f32)
        pl.BlockSpec((sk, 2 * hd), full),             # [bk | dk] (bf16, packed)
        pl.BlockSpec((model_dim, model_dim), full),   # WqT
        pl.BlockSpec((heads, hd), full),              # u
        pl.BlockSpec((heads, hd), full),              # v
        pl.BlockSpec((model_dim, model_dim), full),   # WoT
        pl.BlockSpec((1, model_dim), full),           # bo
        pl.BlockSpec((1, model_dim), full),           # g0
        pl.BlockSpec((1, model_dim), full),           # beta0
        pl.BlockSpec((model_dim, ffn_dim), full),     # W1T
        pl.BlockSpec((1, ffn_dim), full),             # b1
        pl.BlockSpec((ffn_dim, model_dim), full),     # W2T
        pl.BlockSpec((1, model_dim), full),           # b2
        pl.BlockSpec((1, model_dim), full),           # g1
        pl.BlockSpec((1, model_dim), full),           # beta1
    ]
    est2 = (4 * tile_q * model_dim * 4                          # q-in + out f32 (x2 buf)
            + 2 * (2 * model_dim * model_dim + 2 * model_dim * ffn_dim) * 2  # weights bf16
            + 4 * sk * model_dim * 2                            # K + V bf16 (x2 buf)
            + 2 * (sk * 2 * hd * 2 + 2 * tile_q * hd * 4)       # positional tables
            + 3 * tile_q * sk * 4                               # scores / e live copies
            + tile_q * ffn_dim * 4                              # FFN hidden
            + 4 * tile_q * model_dim * 4                        # misc f32 intermediates
            + (sk + tile_q) * 3 * hd * 2 + tile_q * model_dim * 2)  # scratches
    kernel = functools.partial(_block_kernel, heads=heads, head_dim=hd)
    return pl.pallas_call(
        kernel,
        out_shape=jax.ShapeDtypeStruct((sq, model_dim), F32),
        grid_spec=pltpu.PrefetchScalarGridSpec(
            num_scalar_prefetch=0, grid=(sq // tile_q,),
            in_specs=in_specs,
            out_specs=pl.BlockSpec((tile_q, model_dim), q_map),
            scratch_shapes=[
                pltpu.VMEM((tile_q, 3 * hd), BF16),   # fused-score LHS [qva|qvc|qu]
                pltpu.VMEM((sk, 3 * hd), BF16),       # fused-score RHS [bk|dk|k_h]
                pltpu.VMEM((tile_q, model_dim), BF16) # per-head concat for output proj
            ]),
        compiler_params=pltpu.CompilerParams(
            dimension_semantics=("parallel",),
            vmem_limit_bytes=_vmem_limit(est2)),
    )(query, k_proj, v_proj, aq, cq, bkdk,
      params["wqT"], params["u"], params["v"], params["woT"], params["bo"],
      params["g0"], params["beta0"], params["w1T"], params["b1"],
      params["w2T"], params["b2"], params["g1"], params["beta1"])


# ----------------------------------------------------------------------------------
# Pure-JAX f32 reference (mirrors the PyTorch math) for correctness checking.
# ----------------------------------------------------------------------------------
def build_R(head_dim, sq, sk):
    a = jnp.arange(sq, dtype=jnp.float32)[:, None]
    b = jnp.arange(sk, dtype=jnp.float32)[None, :]
    pos = a - b
    d = jnp.arange(head_dim)
    freq = 10000.0 ** (-2.0 * (d // 2).astype(jnp.float32) / head_dim)
    ang = pos[None, :, :] * freq[:, None, None]
    return jnp.where((d % 2 == 0)[:, None, None], jnp.sin(ang), jnp.cos(ang)).astype(
        jnp.float32
    )


def reference_block(value, key, query, p, *, heads, head_dim):
    sq, D = query.shape
    sk = key.shape[0]
    R = build_R(head_dim, sq, sk)
    wk = p["wk"].reshape(heads, head_dim, D)
    wq = p["wq"].reshape(heads, head_dim, D)
    wv = p["wv"].reshape(heads, head_dim, D)
    keys = jnp.einsum("hdm,km->hdk", wk, key)
    queries = jnp.einsum("qm,hdm->hqd", query, wq)
    values = jnp.einsum("vm,hdm->hvd", value, wv)
    UxK = jnp.einsum("hd,hdk->hk", p["u"], keys)[:, None, :]
    att = (jnp.einsum("hqd,hdk->hqk", queries, keys)
           + jnp.einsum("hqd,dqk->hqk", queries, R)
           + UxK
           + jnp.einsum("hd,dqk->hqk", p["v"], R))
    att = jax.nn.softmax(att * head_dim ** -0.5, axis=2)
    att = jnp.einsum("hqk,hkd->hqd", att, values)
    att = att.transpose(1, 0, 2).reshape(sq, D)
    y = att @ p["wo"].T + p["bo"][0]

    def ln(x, g, b):
        mu = x.mean(-1, keepdims=True)
        var = ((x - mu) ** 2).mean(-1, keepdims=True)
        return (x - mu) / jnp.sqrt(var + 1e-5) * g + b

    x = ln(y + query, p["g0"][0], p["beta0"][0])
    h1 = x @ p["w1"].T + p["b1"][0]
    h1 = jnp.where(h1 > 0, h1, jnp.exp(jnp.minimum(h1, 0.0)) - 1.0)
    h2 = h1 @ p["w2"].T + p["b2"][0]
    return ln(h2 + x, p["g1"][0], p["beta1"][0])


# ----------------------------------------------------------------------------------
# Deterministic parameter initialization (shapes from the module __init__).
# ----------------------------------------------------------------------------------
def init_params(rng, model_dim, heads, forward_expansion=4):
    head_dim = model_dim // heads
    ks = jax.random.split(rng, 12)

    def uinit(k, shape, fan_in):
        b = 1.0 / math.sqrt(fan_in)
        return jax.random.uniform(k, shape, jnp.float32, -b, b)

    D, E = model_dim, model_dim * forward_expansion
    return dict(
        wk=uinit(ks[0], (D, D), D),                 # stacked heads x (head_dim, D)
        wq=uinit(ks[1], (D, D), D),
        wv=uinit(ks[2], (D, D), D),
        u=jax.random.uniform(ks[3], (heads, head_dim), jnp.float32),  # torch.rand
        v=jax.random.uniform(ks[4], (heads, head_dim), jnp.float32),
        wo=uinit(ks[5], (D, D), D),
        bo=uinit(ks[6], (1, D), D),
        g0=jnp.ones((1, D), jnp.float32),
        beta0=jnp.zeros((1, D), jnp.float32),
        w1=uinit(ks[7], (E, D), D),
        b1=uinit(ks[8], (1, E), D),
        w2=uinit(ks[9], (D, E), E),
        b2=uinit(ks[10], (1, D), E),
        g1=jnp.ones((1, D), jnp.float32),
        beta1=jnp.zeros((1, D), jnp.float32),
    )


def _run_case(seq, model_dim, heads, tol):
    head_dim = model_dim // heads
    root = jax.random.PRNGKey(0)
    kp, kv_, kk, kq = jax.random.split(root, 4)
    params = init_params(kp, model_dim, heads)

    value = jax.random.normal(kv_, (seq, model_dim), jnp.float32)
    key = jax.random.normal(kk, (seq, model_dim), jnp.float32)
    query = jax.random.normal(kq, (seq, model_dim), jnp.float32)

    prepped = prepare_params(params)   # one-time transpose + bf16 cast, outside jit
    run = jax.jit(
        functools.partial(transformer_block, heads=heads, head_dim=head_dim)
    )
    out = jax.block_until_ready(run(value, key, query, prepped))
    ref = jax.block_until_ready(
        reference_block(value, key, query, params, heads=heads, head_dim=head_dim)
    )
    assert out.shape == (seq, model_dim)
    err = float(jnp.max(jnp.abs(out - ref)))
    # bf16 MXU inputs -> compare to the f32 reference with a loosened tolerance.
    assert jnp.allclose(out, ref, rtol=tol, atol=tol), f"max abs err = {err}"


if __name__ == "__main__":
    _run_case(8, 32, 4, 2e-2)    # single-tile grid (small smoke test)
    _run_case(32, 64, 4, 5e-2)   # multi-tile grid: 2 Sq tiles x 2 Sk tiles
    print("KERNEL_OK")
</pallas_src>

<mosaic_0001>
module attributes {stable_mosaic.version = 11 : i64} {
  func.func @_kv_proj_kernel(%arg0: i32, %arg1: memref<8x32xf32, #tpu.memory_space<vmem>>, %arg2: memref<8x32xf32, #tpu.memory_space<vmem>>, %arg3: memref<32x32xbf16, #tpu.memory_space<vmem>>, %arg4: memref<32x32xbf16, #tpu.memory_space<vmem>>, %arg5: memref<4x8x8xbf16, #tpu.memory_space<vmem>>, %arg6: memref<4x8x8xbf16, #tpu.memory_space<vmem>>) attributes {dimension_semantics = [#tpu.dimension_semantics<parallel>], iteration_bounds = array<i64: 1>, scalar_prefetch = 0 : i64, scratch_operands = 0 : i64, tpu.core_type = #tpu.core_type<tc>, window_params = [{transform_indices = @transform_0, window_bounds = array<i64: 8, 32>}, {transform_indices = @transform_1, window_bounds = array<i64: 8, 32>}, {pipeline_mode = #tpu.pipeline_mode<synchronous>, transform_indices = @transform_2, window_bounds = array<i64: 32, 32>}, {pipeline_mode = #tpu.pipeline_mode<synchronous>, transform_indices = @transform_3, window_bounds = array<i64: 32, 32>}, {transform_indices = @transform_4, window_bounds = array<i64: 4, 8, 8>}, {transform_indices = @transform_5, window_bounds = array<i64: 4, 8, 8>}]} {
    %c0 = arith.constant 0 : index
    %c0_0 = arith.constant 0 : index
    %0 = vector.load %arg1[%c0, %c0_0] : memref<8x32xf32, #tpu.memory_space<vmem>>, vector<8x32xf32>
    %1 = arith.truncf %0 : vector<8x32xf32> to vector<8x32xbf16>
    %c0_1 = arith.constant 0 : index
    %c0_2 = arith.constant 0 : index
    %2 = vector.load %arg3[%c0_1, %c0_2] : memref<32x32xbf16, #tpu.memory_space<vmem>>, vector<32x32xbf16>
    %cst = arith.constant dense<0.000000e+00> : vector<8x32xf32>
    %3 = tpu.matmul %1, %2, %cst {dimension_numbers = #tpu.dot_dimension_numbers<[1], [0], [0], [1], [0, 0, 1, 1], [], []>} : vector<8x32xbf16>, vector<32x32xbf16>, vector<8x32xf32> -> vector<8x32xf32>
    %c0_3 = arith.constant 0 : index
    %c0_4 = arith.constant 0 : index
    %4 = vector.load %arg2[%c0_3, %c0_4] : memref<8x32xf32, #tpu.memory_space<vmem>>, vector<8x32xf32>
    %5 = arith.truncf %4 : vector<8x32xf32> to vector<8x32xbf16>
    %c0_5 = arith.constant 0 : index
    %c0_6 = arith.constant 0 : index
    %6 = vector.load %arg4[%c0_5, %c0_6] : memref<32x32xbf16, #tpu.memory_space<vmem>>, vector<32x32xbf16>
    %cst_7 = arith.constant dense<0.000000e+00> : vector<8x32xf32>
    %7 = tpu.matmul %5, %6, %cst_7 {dimension_numbers = #tpu.dot_dimension_numbers<[1], [0], [0], [1], [0, 0, 1, 1], [], []>} : vector<8x32xbf16>, vector<32x32xbf16>, vector<8x32xf32> -> vector<8x32xf32>
    %8 = vector.extract_strided_slice %3 {offsets = [0, 0], sizes = [8, 8], strides = [1, 1]} : vector<8x32xf32> to vector<8x8xf32>
    %9 = arith.truncf %8 : vector<8x8xf32> to vector<8x8xbf16>
    %c0_8 = arith.constant 0 : index
    %c0_9 = arith.constant 0 : index
    %c0_10 = arith.constant 0 : index
    %10 = vector.load %arg5[%c0_8, %c0_9, %c0_10] : memref<4x8x8xbf16, #tpu.memory_space<vmem>>, vector<1x8x8xbf16>
    %11 = vector.shape_cast %10 : vector<1x8x8xbf16> to vector<8x8xbf16>
    %12 = vector.shape_cast %9 : vector<8x8xbf16> to vector<1x8x8xbf16>
    tpu.vector_store %arg5[%c0_8, %c0_9, %c0_10], %12 {strides = array<i32>} : memref<4x8x8xbf16, #tpu.memory_space<vmem>>, vector<1x8x8xbf16>,
    %13 = vector.extract_strided_slice %7 {offsets = [0, 0], sizes = [8, 8], strides = [1, 1]} : vector<8x32xf32> to vector<8x8xf32>
    %14 = arith.truncf %13 : vector<8x8xf32> to vector<8x8xbf16>
    %c0_11 = arith.constant 0 : index
    %c0_12 = arith.constant 0 : index
    %c0_13 = arith.constant 0 : index
    %15 = vector.load %arg6[%c0_11, %c0_12, %c0_13] : memref<4x8x8xbf16, #tpu.memory_space<vmem>>, vector<1x8x8xbf16>
    %16 = vector.shape_cast %15 : vector<1x8x8xbf16> to vector<8x8xbf16>
    %17 = vector.shape_cast %14 : vector<8x8xbf16> to vector<1x8x8xbf16>
    tpu.vector_store %arg6[%c0_11, %c0_12, %c0_13], %17 {strides = array<i32>} : memref<4x8x8xbf16, #tpu.memory_space<vmem>>, vector<1x8x8xbf16>,
    %18 = vector.extract_strided_slice %3 {offsets = [0, 8], sizes = [8, 8], strides = [1, 1]} : vector<8x32xf32> to vector<8x8xf32>
    %19 = arith.truncf %18 : vector<8x8xf32> to vector<8x8xbf16>
    %c1 = arith.constant 1 : index
    %c0_14 = arith.constant 0 : index
    %c0_15 = arith.constant 0 : index
    %20 = vector.load %arg5[%c1, %c0_14, %c0_15] : memref<4x8x8xbf16, #tpu.memory_space<vmem>>, vector<1x8x8xbf16>
    %21 = vector.shape_cast %20 : vector<1x8x8xbf16> to vector<8x8xbf16>
    %22 = vector.shape_cast %19 : vector<8x8xbf16> to vector<1x8x8xbf16>
    tpu.vector_store %arg5[%c1, %c0_14, %c0_15], %22 {strides = array<i32>} : memref<4x8x8xbf16, #tpu.memory_space<vmem>>, vector<1x8x8xbf16>,
    %23 = vector.extract_strided_slice %7 {offsets = [0, 8], sizes = [8, 8], strides = [1, 1]} : vector<8x32xf32> to vector<8x8xf32>
    %24 = arith.truncf %23 : vector<8x8xf32> to vector<8x8xbf16>
    %c1_16 = arith.constant 1 : index
    %c0_17 = arith.constant 0 : index
    %c0_18 = arith.constant 0 : index
    %25 = vector.load %arg6[%c1_16, %c0_17, %c0_18] : memref<4x8x8xbf16, #tpu.memory_space<vmem>>, vector<1x8x8xbf16>
    %26 = vector.shape_cast %25 : vector<1x8x8xbf16> to vector<8x8xbf16>
    %27 = vector.shape_cast %24 : vector<8x8xbf16> to vector<1x8x8xbf16>
    tpu.vector_store %arg6[%c1_16, %c0_17, %c0_18], %27 {strides = array<i32>} : memref<4x8x8xbf16, #tpu.memory_space<vmem>>, vector<1x8x8xbf16>,
    %28 = vector.extract_strided_slice %3 {offsets = [0, 16], sizes = [8, 8], strides = [1, 1]} : vector<8x32xf32> to vector<8x8xf32>
    %29 = arith.truncf %28 : vector<8x8xf32> to vector<8x8xbf16>
    %c2 = arith.constant 2 : index
    %c0_19 = arith.constant 0 : index
    %c0_20 = arith.constant 0 : index
    %30 = vector.load %arg5[%c2, %c0_19, %c0_20] : memref<4x8x8xbf16, #tpu.memory_space<vmem>>, vector<1x8x8xbf16>
    %31 = vector.shape_cast %30 : vector<1x8x8xbf16> to vector<8x8xbf16>
    %32 = vector.shape_cast %29 : vector<8x8xbf16> to vector<1x8x8xbf16>
    tpu.vector_store %arg5[%c2, %c0_19, %c0_20], %32 {strides = array<i32>} : memref<4x8x8xbf16, #tpu.memory_space<vmem>>, vector<1x8x8xbf16>,
    %33 = vector.extract_strided_slice %7 {offsets = [0, 16], sizes = [8, 8], strides = [1, 1]} : vector<8x32xf32> to vector<8x8xf32>
    %34 = arith.truncf %33 : vector<8x8xf32> to vector<8x8xbf16>
    %c2_21 = arith.constant 2 : index
    %c0_22 = arith.constant 0 : index
    %c0_23 = arith.constant 0 : index
    %35 = vector.load %arg6[%c2_21, %c0_22, %c0_23] : memref<4x8x8xbf16, #tpu.memory_space<vmem>>, vector<1x8x8xbf16>
    %36 = vector.shape_cast %35 : vector<1x8x8xbf16> to vector<8x8xbf16>
    %37 = vector.shape_cast %34 : vector<8x8xbf16> to vector<1x8x8xbf16>
    tpu.vector_store %arg6[%c2_21, %c0_22, %c0_23], %37 {strides = array<i32>} : memref<4x8x8xbf16, #tpu.memory_space<vmem>>, vector<1x8x8xbf16>,
    %38 = vector.extract_strided_slice %3 {offsets = [0, 24], sizes = [8, 8], strides = [1, 1]} : vector<8x32xf32> to vector<8x8xf32>
    %39 = arith.truncf %38 : vector<8x8xf32> to vector<8x8xbf16>
    %c3 = arith.constant 3 : index
    %c0_24 = arith.constant 0 : index
    %c0_25 = arith.constant 0 : index
    %40 = vector.load %arg5[%c3, %c0_24, %c0_25] : memref<4x8x8xbf16, #tpu.memory_space<vmem>>, vector<1x8x8xbf16>
    %41 = vector.shape_cast %40 : vector<1x8x8xbf16> to vector<8x8xbf16>
    %42 = vector.shape_cast %39 : vector<8x8xbf16> to vector<1x8x8xbf16>
    tpu.vector_store %arg5[%c3, %c0_24, %c0_25], %42 {strides = array<i32>} : memref<4x8x8xbf16, #tpu.memory_space<vmem>>, vector<1x8x8xbf16>,
    %43 = vector.extract_strided_slice %7 {offsets = [0, 24], sizes = [8, 8], strides = [1, 1]} : vector<8x32xf32> to vector<8x8xf32>
    %44 = arith.truncf %43 : vector<8x8xf32> to vector<8x8xbf16>
    %c3_26 = arith.constant 3 : index
    %c0_27 = arith.constant 0 : index
    %c0_28 = arith.constant 0 : index
    %45 = vector.load %arg6[%c3_26, %c0_27, %c0_28] : memref<4x8x8xbf16, #tpu.memory_space<vmem>>, vector<1x8x8xbf16>
    %46 = vector.shape_cast %45 : vector<1x8x8xbf16> to vector<8x8xbf16>
    %47 = vector.shape_cast %44 : vector<8x8xbf16> to vector<1x8x8xbf16>
    tpu.vector_store %arg6[%c3_26, %c0_27, %c0_28], %47 {strides = array<i32>} : memref<4x8x8xbf16, #tpu.memory_space<vmem>>, vector<1x8x8xbf16>,
    return
  }
  func.func @transform_0(%arg0: i32) -> (i32, i32) {
    %c0_i32 = arith.constant 0 : i32
    %c0_i32_0 = arith.constant 0 : i32
    return %arg0, %c0_i32 : i32, i32
  }
  func.func @transform_1(%arg0: i32) -> (i32, i32) {
    %c0_i32 = arith.constant 0 : i32
    %c0_i32_0 = arith.constant 0 : i32
    return %arg0, %c0_i32 : i32, i32
  }
  func.func @transform_2(%arg0: i32) -> (i32, i32) {
    %c0_i32 = arith.constant 0 : i32
    %c0_i32_0 = arith.constant 0 : i32
    %c0_i32_1 = arith.constant 0 : i32
    return %c0_i32, %c0_i32_0 : i32, i32
  }
  func.func @transform_3(%arg0: i32) -> (i32, i32) {
    %c0_i32 = arith.constant 0 : i32
    %c0_i32_0 = arith.constant 0 : i32
    %c0_i32_1 = arith.constant 0 : i32
    return %c0_i32, %c0_i32_0 : i32, i32
  }
  func.func @transform_4(%arg0: i32) -> (i32, i32, i32) {
    %c0_i32 = arith.constant 0 : i32
    %c0_i32_0 = arith.constant 0 : i32
    %c0_i32_1 = arith.constant 0 : i32
    return %c0_i32, %arg0, %c0_i32_0 : i32, i32, i32
  }
  func.func @transform_5(%arg0: i32) -> (i32, i32, i32) {
    %c0_i32 = arith.constant 0 : i32
    %c0_i32_0 = arith.constant 0 : i32
    %c0_i32_1 = arith.constant 0 : i32
    return %c0_i32, %arg0, %c0_i32_0 : i32, i32, i32
  }
}

module attributes {stable_mosaic.version = 11 : i64} {
  func.func @_block_kernel(%arg0: i32, %arg1: memref<8x32xf32, #tpu.memory_space<vmem>>, %arg2: memref<4x8x8xbf16, #tpu.memory_space<vmem>>, %arg3: memref<4x8x8xbf16, #tpu.memory_space<vmem>>, %arg4: memref<8x8xf32, #tpu.memory_space<vmem>>, %arg5: memref<8x8xf32, #tpu.memory_space<vmem>>, %arg6: memref<8x16xbf16, #tpu.memory_space<vmem>>, %arg7: memref<32x32xbf16, #tpu.memory_space<vmem>>, %arg8: memref<4x8xf32, #tpu.memory_space<vmem>>, %arg9: memref<4x8xf32, #tpu.memory_space<vmem>>, %arg10: memref<32x32xbf16, #tpu.memory_space<vmem>>, %arg11: memref<1x32xf32, #tpu.memory_space<vmem>>, %arg12: memref<1x32xf32, #tpu.memory_space<vmem>>, %arg13: memref<1x32xf32, #tpu.memory_space<vmem>>, %arg14: memref<32x128xbf16, #tpu.memory_space<vmem>>, %arg15: memref<1x128xf32, #tpu.memory_space<vmem>>, %arg16: memref<128x32xbf16, #tpu.memory_space<vmem>>, %arg17: memref<1x32xf32, #tpu.memory_space<vmem>>, %arg18: memref<1x32xf32, #tpu.memory_space<vmem>>, %arg19: memref<1x32xf32, #tpu.memory_space<vmem>>, %arg20: memref<8x32xf32, #tpu.memory_space<vmem>>, %arg21: memref<8x24xbf16, #tpu.memory_space<vmem>>, %arg22: memref<8x24xbf16, #tpu.memory_space<vmem>>, %arg23: memref<8x32xbf16, #tpu.memory_space<vmem>>) attributes {dimension_semantics = [#tpu.dimension_semantics<parallel>], iteration_bounds = array<i64: 1>, scalar_prefetch = 0 : i64, scratch_operands = 3 : i64, tpu.core_type = #tpu.core_type<tc>, window_params = [{transform_indices = @transform_0, window_bounds = array<i64: 8, 32>}, {pipeline_mode = #tpu.pipeline_mode<synchronous>, transform_indices = @transform_1, window_bounds = array<i64: 4, 8, 8>}, {pipeline_mode = #tpu.pipeline_mode<synchronous>, transform_indices = @transform_2, window_bounds = array<i64: 4, 8, 8>}, {transform_indices = @transform_3, window_bounds = array<i64: 8, 8>}, {transform_indices = @transform_4, window_bounds = array<i64: 8, 8>}, {pipeline_mode = #tpu.pipeline_mode<synchronous>, transform_indices = @transform_5, window_bounds = array<i64: 8, 16>}, {pipeline_mode = #tpu.pipeline_mode<synchronous>, transform_indices = @transform_6, window_bounds = array<i64: 32, 32>}, {pipeline_mode = #tpu.pipeline_mode<synchronous>, transform_indices = @transform_7, window_bounds = array<i64: 4, 8>}, {pipeline_mode = #tpu.pipeline_mode<synchronous>, transform_indices = @transform_8, window_bounds = array<i64: 4, 8>}, {pipeline_mode = #tpu.pipeline_mode<synchronous>, transform_indices = @transform_9, window_bounds = array<i64: 32, 32>}, {pipeline_mode = #tpu.pipeline_mode<synchronous>, transform_indices = @transform_10, window_bounds = array<i64: 1, 32>}, {pipeline_mode = #tpu.pipeline_mode<synchronous>, transform_indices = @transform_11, window_bounds = array<i64: 1, 32>}, {pipeline_mode = #tpu.pipeline_mode<synchronous>, transform_indices = @transform_12, window_bounds = array<i64: 1, 32>}, {pipeline_mode = #tpu.pipeline_mode<synchronous>, transform_indices = @transform_13, window_bounds = array<i64: 32, 128>}, {pipeline_mode = #tpu.pipeline_mode<synchronous>, transform_indices = @transform_14, window_bounds = array<i64: 1, 128>}, {pipeline_mode = #tpu.pipeline_mode<synchronous>, transform_indices = @transform_15, window_bounds = array<i64: 128, 32>}, {pipeline_mode = #tpu.pipeline_mode<synchronous>, transform_indices = @transform_16, window_bounds = array<i64: 1, 32>}, {pipeline_mode = #tpu.pipeline_mode<synchronous>, transform_indices = @transform_17, window_bounds = array<i64: 1, 32>}, {pipeline_mode = #tpu.pipeline_mode<synchronous>, transform_indices = @transform_18, window_bounds = array<i64: 1, 32>}, {transform_indices = @transform_19, window_bounds = array<i64: 8, 32>}]} {
    %c0 = arith.constant 0 : index
    %c0_0 = arith.constant 0 : index
    %0 = vector.load %arg1[%c0, %c0_0] : memref<8x32xf32, #tpu.memory_space<vmem>>, vector<8x32xf32>
    %1 = arith.truncf %0 : vector<8x32xf32> to vector<8x32xbf16>
    %c0_1 = arith.constant 0 : index
    %c0_2 = arith.constant 0 : index
    %2 = vector.load %arg7[%c0_1, %c0_2] : memref<32x32xbf16, #tpu.memory_space<vmem>>, vector<32x32xbf16>
    %cst = arith.constant dense<0.000000e+00> : vector<8x32xf32>
    %3 = tpu.matmul %1, %2, %cst {dimension_numbers = #tpu.dot_dimension_numbers<[1], [0], [0], [1], [0, 0, 1, 1], [], []>} : vector<8x32xbf16>, vector<32x32xbf16>, vector<8x32xf32> -> vector<8x32xf32>
    %c0_3 = arith.constant 0 : index
    %c0_4 = arith.constant 0 : index
    %4 = vector.load %arg4[%c0_3, %c0_4] : memref<8x8xf32, #tpu.memory_space<vmem>>, vector<8x8xf32>
    %c0_5 = arith.constant 0 : index
    %c0_6 = arith.constant 0 : index
    %5 = vector.load %arg5[%c0_5, %c0_6] : memref<8x8xf32, #tpu.memory_space<vmem>>, vector<8x8xf32>
    %c0_7 = arith.constant 0 : index
    %c0_8 = arith.constant 0 : index
    %6 = vector.load %arg6[%c0_7, %c0_8] : memref<8x16xbf16, #tpu.memory_space<vmem>>, vector<8x16xbf16>
    %c0_9 = arith.constant 0 : index
    %c0_10 = arith.constant 0 : index
    %7 = vector.load %arg22[%c0_9, %c0_10] : memref<8x24xbf16, #tpu.memory_space<vmem>>, vector<8x16xbf16>
    tpu.vector_store %arg22[%c0_9, %c0_10], %6 {strides = array<i32>} : memref<8x24xbf16, #tpu.memory_space<vmem>>, vector<8x16xbf16>,
    %8 = vector.extract_strided_slice %3 {offsets = [0, 0], sizes = [8, 8], strides = [1, 1]} : vector<8x32xf32> to vector<8x8xf32>
    %c0_11 = arith.constant 0 : index
    %c0_12 = arith.constant 0 : index
    %9 = vector.load %arg8[%c0_11, %c0_12] : memref<4x8xf32, #tpu.memory_space<vmem>>, vector<1x8xf32>
    %c0_13 = arith.constant 0 : index
    %c0_14 = arith.constant 0 : index
    %10 = vector.load %arg9[%c0_13, %c0_14] : memref<4x8xf32, #tpu.memory_space<vmem>>, vector<1x8xf32>
    %11 = vector.broadcast %9 : vector<1x8xf32> to vector<8x8xf32>
    %12 = arith.addf %8, %11 : vector<8x8xf32>
    %cst_15 = arith.constant 0.353553385 : f32
    %13 = vector.broadcast %cst_15 : f32 to vector<8x8xf32>
    %14 = arith.mulf %12, %13 : vector<8x8xf32>
    %15 = arith.truncf %14 : vector<8x8xf32> to vector<8x8xbf16>
    %16 = vector.broadcast %10 : vector<1x8xf32> to vector<8x8xf32>
    %17 = arith.addf %8, %16 : vector<8x8xf32>
    %cst_16 = arith.constant 0.353553385 : f32
    %18 = vector.broadcast %cst_16 : f32 to vector<8x8xf32>
    %19 = arith.mulf %17, %18 : vector<8x8xf32>
    %20 = arith.mulf %19, %4 : vector<8x8xf32>
    %21 = arith.truncf %20 : vector<8x8xf32> to vector<8x8xbf16>
    %c0_17 = arith.constant 0 : index
    %c0_18 = arith.constant 0 : index
    %22 = vector.load %arg21[%c0_17, %c0_18] : memref<8x24xbf16, #tpu.memory_space<vmem>>, vector<8x8xbf16>
    tpu.vector_store %arg21[%c0_17, %c0_18], %21 {strides = array<i32>} : memref<8x24xbf16, #tpu.memory_space<vmem>>, vector<8x8xbf16>,
    %23 = arith.mulf %19, %5 : vector<8x8xf32>
    %24 = arith.truncf %23 : vector<8x8xf32> to vector<8x8xbf16>
    %c0_19 = arith.constant 0 : index
    %c8 = arith.constant 8 : index
    %25 = vector.load %arg21[%c0_19, %c8] : memref<8x24xbf16, #tpu.memory_space<vmem>>, vector<8x8xbf16>
    tpu.vector_store %arg21[%c0_19, %c8], %24 {strides = array<i32>} : memref<8x24xbf16, #tpu.memory_space<vmem>>, vector<8x8xbf16>,
    %c0_20 = arith.constant 0 : index
    %c16 = arith.constant 16 : index
    %26 = vector.load %arg21[%c0_20, %c16] : memref<8x24xbf16, #tpu.memory_space<vmem>>, vector<8x8xbf16>
    tpu.vector_store %arg21[%c0_20, %c16], %15 {strides = array<i32>} : memref<8x24xbf16, #tpu.memory_space<vmem>>, vector<8x8xbf16>,
    %c0_21 = arith.constant 0 : index
    %c0_22 = arith.constant 0 : index
    %c0_23 = arith.constant 0 : index
    %27 = vector.load %arg2[%c0_21, %c0_22, %c0_23] : memref<4x8x8xbf16, #tpu.memory_space<vmem>>, vector<1x8x8xbf16>
    %28 = vector.shape_cast %27 : vector<1x8x8xbf16> to vector<8x8xbf16>
    %c0_24 = arith.constant 0 : index
    %c16_25 = arith.constant 16 : index
    %29 = vector.load %arg22[%c0_24, %c16_25] : memref<8x24xbf16, #tpu.memory_space<vmem>>, vector<8x8xbf16>
    tpu.vector_store %arg22[%c0_24, %c16_25], %28 {strides = array<i32>} : memref<8x24xbf16, #tpu.memory_space<vmem>>, vector<8x8xbf16>,
    %c0_26 = arith.constant 0 : index
    %c0_27 = arith.constant 0 : index
    %30 = vector.load %arg21[%c0_26, %c0_27] : memref<8x24xbf16, #tpu.memory_space<vmem>>, vector<8x24xbf16>
    %c0_28 = arith.constant 0 : index
    %c0_29 = arith.constant 0 : index
    %31 = vector.load %arg22[%c0_28, %c0_29] : memref<8x24xbf16, #tpu.memory_space<vmem>>, vector<8x24xbf16>
    %cst_30 = arith.constant dense<0.000000e+00> : vector<8x8xf32>
    %32 = tpu.matmul %30, %31, %cst_30 {dimension_numbers = #tpu.dot_dimension_numbers<[1], [1], [0], [0], [0, 0, 1, 0], [], []>} : vector<8x24xbf16>, vector<8x24xbf16>, vector<8x8xf32> -> vector<8x8xf32>
    %cst_31 = arith.constant dense<0xFF800000> : vector<8xf32>
    %33 = vector.multi_reduction <maximumf>, %32, %cst_31 [1] : vector<8x8xf32> to vector<8xf32>
    %34 = vector.shape_cast %33 : vector<8xf32> to vector<8x1xf32>
    %35 = vector.broadcast %34 : vector<8x1xf32> to vector<8x8xf32>
    %36 = arith.subf %32, %35 : vector<8x8xf32>
    %37 = math.exp %36 : vector<8x8xf32>
    %cst_32 = arith.constant dense<0.000000e+00> : vector<8xf32>
    %38 = vector.multi_reduction <add>, %37, %cst_32 [1] : vector<8x8xf32> to vector<8xf32>
    %39 = vector.shape_cast %38 : vector<8xf32> to vector<8x1xf32>
    %40 = arith.truncf %37 : vector<8x8xf32> to vector<8x8xbf16>
    %c0_33 = arith.constant 0 : index
    %c0_34 = arith.constant 0 : index
    %c0_35 = arith.constant 0 : index
    %41 = vector.load %arg3[%c0_33, %c0_34, %c0_35] : memref<4x8x8xbf16, #tpu.memory_space<vmem>>, vector<1x8x8xbf16>
    %42 = vector.shape_cast %41 : vector<1x8x8xbf16> to vector<8x8xbf16>
    %cst_36 = arith.constant dense<0.000000e+00> : vector<8x8xf32>
    %43 = tpu.matmul %40, %42, %cst_36 {dimension_numbers = #tpu.dot_dimension_numbers<[1], [0], [0], [1], [0, 0, 1, 1], [], []>} : vector<8x8xbf16>, vector<8x8xbf16>, vector<8x8xf32> -> vector<8x8xf32>
    %cst_37 = arith.constant 1.000000e+00 : f32
    %44 = vector.broadcast %cst_37 : f32 to vector<8x1xf32>
    %45 = arith.divf %44, %39 : vector<8x1xf32>
    %46 = vector.broadcast %45 : vector<8x1xf32> to vector<8x8xf32>
    %47 = arith.mulf %43, %46 : vector<8x8xf32>
    %48 = arith.truncf %47 : vector<8x8xf32> to vector<8x8xbf16>
    %c0_38 = arith.constant 0 : index
    %c0_39 = arith.constant 0 : index
    %49 = vector.load %arg23[%c0_38, %c0_39] : memref<8x32xbf16, #tpu.memory_space<vmem>>, vector<8x8xbf16>
    tpu.vector_store %arg23[%c0_38, %c0_39], %48 {strides = array<i32>} : memref<8x32xbf16, #tpu.memory_space<vmem>>, vector<8x8xbf16>,
    %50 = vector.extract_strided_slice %3 {offsets = [0, 8], sizes = [8, 8], strides = [1, 1]} : vector<8x32xf32> to vector<8x8xf32>
    %c1 = arith.constant 1 : index
    %c0_40 = arith.constant 0 : index
    %51 = vector.load %arg8[%c1, %c0_40] : memref<4x8xf32, #tpu.memory_space<vmem>>, vector<1x8xf32>
    %c1_41 = arith.constant 1 : index
    %c0_42 = arith.constant 0 : index
    %52 = vector.load %arg9[%c1_41, %c0_42] : memref<4x8xf32, #tpu.memory_space<vmem>>, vector<1x8xf32>
    %53 = vector.broadcast %51 : vector<1x8xf32> to vector<8x8xf32>
    %54 = arith.addf %50, %53 : vector<8x8xf32>
    %cst_43 = arith.constant 0.353553385 : f32
    %55 = vector.broadcast %cst_43 : f32 to vector<8x8xf32>
    %56 = arith.mulf %54, %55 : vector<8x8xf32>
    %57 = arith.truncf %56 : vector<8x8xf32> to vector<8x8xbf16>
    %58 = vector.broadcast %52 : vector<1x8xf32> to vector<8x8xf32>
    %59 = arith.addf %50, %58 : vector<8x8xf32>
    %cst_44 = arith.constant 0.353553385 : f32
    %60 = vector.broadcast %cst_44 : f32 to vector<8x8xf32>
    %61 = arith.mulf %59, %60 : vector<8x8xf32>
    %62 = arith.mulf %61, %4 : vector<8x8xf32>
    %63 = arith.truncf %62 : vector<8x8xf32> to vector<8x8xbf16>
    %c0_45 = arith.constant 0 : index
    %c0_46 = arith.constant 0 : index
    %64 = vector.load %arg21[%c0_45, %c0_46] : memref<8x24xbf16, #tpu.memory_space<vmem>>, vector<8x8xbf16>
    tpu.vector_store %arg21[%c0_45, %c0_46], %63 {strides = array<i32>} : memref<8x24xbf16, #tpu.memory_space<vmem>>, vector<8x8xbf16>,
    %65 = arith.mulf %61, %5 : vector<8x8xf32>
    %66 = arith.truncf %65 : vector<8x8xf32> to vector<8x8xbf16>
    %c0_47 = arith.constant 0 : index
    %c8_48 = arith.constant 8 : index
    %67 = vector.load %arg21[%c0_47, %c8_48] : memref<8x24xbf16, #tpu.memory_space<vmem>>, vector<8x8xbf16>
    tpu.vector_store %arg21[%c0_47, %c8_48], %66 {strides = array<i32>} : memref<8x24xbf16, #tpu.memory_space<vmem>>, vector<8x8xbf16>,
    %c0_49 = arith.constant 0 : index
    %c16_50 = arith.constant 16 : index
    %68 = vector.load %arg21[%c0_49, %c16_50] : memref<8x24xbf16, #tpu.memory_space<vmem>>, vector<8x8xbf16>
    tpu.vector_store %arg21[%c0_49, %c16_50], %57 {strides = array<i32>} : memref<8x24xbf16, #tpu.memory_space<vmem>>, vector<8x8xbf16>,
    %c1_51 = arith.constant 1 : index
    %c0_52 = arith.constant 0 : index
    %c0_53 = arith.constant 0 : index
    %69 = vector.load %arg2[%c1_51, %c0_52, %c0_53] : memref<4x8x8xbf16, #tpu.memory_space<vmem>>, vector<1x8x8xbf16>
    %70 = vector.shape_cast %69 : vector<1x8x8xbf16> to vector<8x8xbf16>
    %c0_54 = arith.constant 0 : index
    %c16_55 = arith.constant 16 : index
    %71 = vector.load %arg22[%c0_54, %c16_55] : memref<8x24xbf16, #tpu.memory_space<vmem>>, vector<8x8xbf16>
    tpu.vector_store %arg22[%c0_54, %c16_55], %70 {strides = array<i32>} : memref<8x24xbf16, #tpu.memory_space<vmem>>, vector<8x8xbf16>,
    %c0_56 = arith.constant 0 : index
    %c0_57 = arith.constant 0 : index
    %72 = vector.load %arg21[%c0_56, %c0_57] : memref<8x24xbf16, #tpu.memory_space<vmem>>, vector<8x24xbf16>
    %c0_58 = arith.constant 0 : index
    %c0_59 = arith.constant 0 : index
    %73 = vector.load %arg22[%c0_58, %c0_59] : memref<8x24xbf16, #tpu.memory_space<vmem>>, vector<8x24xbf16>
    %cst_60 = arith.constant dense<0.000000e+00> : vector<8x8xf32>
    %74 = tpu.matmul %72, %73, %cst_60 {dimension_numbers = #tpu.dot_dimension_numbers<[1], [1], [0], [0], [0, 0, 1, 0], [], []>} : vector<8x24xbf16>, vector<8x24xbf16>, vector<8x8xf32> -> vector<8x8xf32>
    %cst_61 = arith.constant dense<0xFF800000> : vector<8xf32>
    %75 = vector.multi_reduction <maximumf>, %74, %cst_61 [1] : vector<8x8xf32> to vector<8xf32>
    %76 = vector.shape_cast %75 : vector<8xf32> to vector<8x1xf32>
    %77 = vector.broadcast %76 : vector<8x1xf32> to vector<8x8xf32>
    %78 = arith.subf %74, %77 : vector<8x8xf32>
    %79 = math.exp %78 : vector<8x8xf32>
    %cst_62 = arith.constant dense<0.000000e+00> : vector<8xf32>
    %80 = vector.multi_reduction <add>, %79, %cst_62 [1] : vector<8x8xf32> to vector<8xf32>
    %81 = vector.shape_cast %80 : vector<8xf32> to vector<8x1xf32>
    %82 = arith.truncf %79 : vector<8x8xf32> to vector<8x8xbf16>
    %c1_63 = arith.constant 1 : index
    %c0_64 = arith.constant 0 : index
    %c0_65 = arith.constant 0 : index
    %83 = vector.load %arg3[%c1_63, %c0_64, %c0_65] : memref<4x8x8xbf16, #tpu.memory_space<vmem>>, vector<1x8x8xbf16>
    %84 = vector.shape_cast %83 : vector<1x8x8xbf16> to vector<8x8xbf16>
    %cst_66 = arith.constant dense<0.000000e+00> : vector<8x8xf32>
    %85 = tpu.matmul %82, %84, %cst_66 {dimension_numbers = #tpu.dot_dimension_numbers<[1], [0], [0], [1], [0, 0, 1, 1], [], []>} : vector<8x8xbf16>, vector<8x8xbf16>, vector<8x8xf32> -> vector<8x8xf32>
    %cst_67 = arith.constant 1.000000e+00 : f32
    %86 = vector.broadcast %cst_67 : f32 to vector<8x1xf32>
    %87 = arith.divf %86, %81 : vector<8x1xf32>
    %88 = vector.broadcast %87 : vector<8x1xf32> to vector<8x8xf32>
    %89 = arith.mulf %85, %88 : vector<8x8xf32>
    %90 = arith.truncf %89 : vector<8x8xf32> to vector<8x8xbf16>
    %c0_68 = arith.constant 0 : index
    %c8_69 = arith.constant 8 : index
    %91 = vector.load %arg23[%c0_68, %c8_69] : memref<8x32xbf16, #tpu.memory_space<vmem>>, vector<8x8xbf16>
    tpu.vector_store %arg23[%c0_68, %c8_69], %90 {strides = array<i32>} : memref<8x32xbf16, #tpu.memory_space<vmem>>, vector<8x8xbf16>,
    %92 = vector.extract_strided_slice %3 {offsets = [0, 16], sizes = [8, 8], strides = [1, 1]} : vector<8x32xf32> to vector<8x8xf32>
    %c2 = arith.constant 2 : index
    %c0_70 = arith.constant 0 : index
    %93 = vector.load %arg8[%c2, %c0_70] : memref<4x8xf32, #tpu.memory_space<vmem>>, vector<1x8xf32>
    %c2_71 = arith.constant 2 : index
    %c0_72 = arith.constant 0 : index
    %94 = vector.load %arg9[%c2_71, %c0_72] : memref<4x8xf32, #tpu.memory_space<vmem>>, vector<1x8xf32>
    %95 = vector.broadcast %93 : vector<1x8xf32> to vector<8x8xf32>
    %96 = arith.addf %92, %95 : vector<8x8xf32>
    %cst_73 = arith.constant 0.353553385 : f32
    %97 = vector.broadcast %cst_73 : f32 to vector<8x8xf32>
    %98 = arith.mulf %96, %97 : vector<8x8xf32>
    %99 = arith.truncf %98 : vector<8x8xf32> to vector<8x8xbf16>
    %100 = vector.broadcast %94 : vector<1x8xf32> to vector<8x8xf32>
    %101 = arith.addf %92, %100 : vector<8x8xf32>
    %cst_74 = arith.constant 0.353553385 : f32
    %102 = vector.broadcast %cst_74 : f32 to vector<8x8xf32>
    %103 = arith.mulf %101, %102 : vector<8x8xf32>
    %104 = arith.mulf %103, %4 : vector<8x8xf32>
    %105 = arith.truncf %104 : vector<8x8xf32> to vector<8x8xbf16>
    %c0_75 = arith.constant 0 : index
    %c0_76 = arith.constant 0 : index
    %106 = vector.load %arg21[%c0_75, %c0_76] : memref<8x24xbf16, #tpu.memory_space<vmem>>, vector<8x8xbf16>
    tpu.vector_store %arg21[%c0_75, %c0_76], %105 {strides = array<i32>} : memref<8x24xbf16, #tpu.memory_space<vmem>>, vector<8x8xbf16>,
    %107 = arith.mulf %103, %5 : vector<8x8xf32>
    %108 = arith.truncf %107 : vector<8x8xf32> to vector<8x8xbf16>
    %c0_77 = arith.constant 0 : index
    %c8_78 = arith.constant 8 : index
    %109 = vector.load %arg21[%c0_77, %c8_78] : memref<8x24xbf16, #tpu.memory_space<vmem>>, vector<8x8xbf16>
    tpu.vector_store %arg21[%c0_77, %c8_78], %108 {strides = array<i32>} : memref<8x24xbf16, #tpu.memory_space<vmem>>, vector<8x8xbf16>,
    %c0_79 = arith.constant 0 : index
    %c16_80 = arith.constant 16 : index
    %110 = vector.load %arg21[%c0_79, %c16_80] : memref<8x24xbf16, #tpu.memory_space<vmem>>, vector<8x8xbf16>
    tpu.vector_store %arg21[%c0_79, %c16_80], %99 {strides = array<i32>} : memref<8x24xbf16, #tpu.memory_space<vmem>>, vector<8x8xbf16>,
    %c2_81 = arith.constant 2 : index
    %c0_82 = arith.constant 0 : index
    %c0_83 = arith.constant 0 : index
    %111 = vector.load %arg2[%c2_81, %c0_82, %c0_83] : memref<4x8x8xbf16, #tpu.memory_space<vmem>>, vector<1x8x8xbf16>
    %112 = vector.shape_cast %111 : vector<1x8x8xbf16> to vector<8x8xbf16>
    %c0_84 = arith.constant 0 : index
    %c16_85 = arith.constant 16 : index
    %113 = vector.load %arg22[%c0_84, %c16_85] : memref<8x24xbf16, #tpu.memory_space<vmem>>, vector<8x8xbf16>
    tpu.vector_store %arg22[%c0_84, %c16_85], %112 {strides = array<i32>} : memref<8x24xbf16, #tpu.memory_space<vmem>>, vector<8x8xbf16>,
    %c0_86 = arith.constant 0 : index
    %c0_87 = arith.constant 0 : index
    %114 = vector.load %arg21[%c0_86, %c0_87] : memref<8x24xbf16, #tpu.memory_space<vmem>>, vector<8x24xbf16>
    %c0_88 = arith.constant 0 : index
    %c0_89 = arith.constant 0 : index
    %115 = vector.load %arg22[%c0_88, %c0_89] : memref<8x24xbf16, #tpu.memory_space<vmem>>, vector<8x24xbf16>
    %cst_90 = arith.constant dense<0.000000e+00> : vector<8x8xf32>
    %116 = tpu.matmul %114, %115, %cst_90 {dimension_numbers = #tpu.dot_dimension_numbers<[1], [1], [0], [0], [0, 0, 1, 0], [], []>} : vector<8x24xbf16>, vector<8x24xbf16>, vector<8x8xf32> -> vector<8x8xf32>
    %cst_91 = arith.constant dense<0xFF800000> : vector<8xf32>
    %117 = vector.multi_reduction <maximumf>, %116, %cst_91 [1] : vector<8x8xf32> to vector<8xf32>
    %118 = vector.shape_cast %117 : vector<8xf32> to vector<8x1xf32>
    %119 = vector.broadcast %118 : vector<8x1xf32> to vector<8x8xf32>
    %120 = arith.subf %116, %119 : vector<8x8xf32>
    %121 = math.exp %120 : vector<8x8xf32>
    %cst_92 = arith.constant dense<0.000000e+00> : vector<8xf32>
    %122 = vector.multi_reduction <add>, %121, %cst_92 [1] : vector<8x8xf32> to vector<8xf32>
    %123 = vector.shape_cast %122 : vector<8xf32> to vector<8x1xf32>
    %124 = arith.truncf %121 : vector<8x8xf32> to vector<8x8xbf16>
    %c2_93 = arith.constant 2 : index
    %c0_94 = arith.constant 0 : index
    %c0_95 = arith.constant 0 : index
    %125 = vector.load %arg3[%c2_93, %c0_94, %c0_95] : memref<4x8x8xbf16, #tpu.memory_space<vmem>>, vector<1x8x8xbf16>
    %126 = vector.shape_cast %125 : vector<1x8x8xbf16> to vector<8x8xbf16>
    %cst_96 = arith.constant dense<0.000000e+00> : vector<8x8xf32>
    %127 = tpu.matmul %124, %126, %cst_96 {dimension_numbers = #tpu.dot_dimension_numbers<[1], [0], [0], [1], [0, 0, 1, 1], [], []>} : vector<8x8xbf16>, vector<8x8xbf16>, vector<8x8xf32> -> vector<8x8xf32>
    %cst_97 = arith.constant 1.000000e+00 : f32
    %128 = vector.broadcast %cst_97 : f32 to vector<8x1xf32>
    %129 = arith.divf %128, %123 : vector<8x1xf32>
    %130 = vector.broadcast %129 : vector<8x1xf32> to vector<8x8xf32>
    %131 = arith.mulf %127, %130 : vector<8x8xf32>
    %132 = arith.truncf %131 : vector<8x8xf32> to vector<8x8xbf16>
    %c0_98 = arith.constant 0 : index
    %c16_99 = arith.constant 16 : index
    %133 = vector.load %arg23[%c0_98, %c16_99] : memref<8x32xbf16, #tpu.memory_space<vmem>>, vector<8x8xbf16>
    tpu.vector_store %arg23[%c0_98, %c16_99], %132 {strides = array<i32>} : memref<8x32xbf16, #tpu.memory_space<vmem>>, vector<8x8xbf16>,
    %134 = vector.extract_strided_slice %3 {offsets = [0, 24], sizes = [8, 8], strides = [1, 1]} : vector<8x32xf32> to vector<8x8xf32>
    %c3 = arith.constant 3 : index
    %c0_100 = arith.constant 0 : index
    %135 = vector.load %arg8[%c3, %c0_100] : memref<4x8xf32, #tpu.memory_space<vmem>>, vector<1x8xf32>
    %c3_101 = arith.constant 3 : index
    %c0_102 = arith.constant 0 : index
    %136 = vector.load %arg9[%c3_101, %c0_102] : memref<4x8xf32, #tpu.memory_space<vmem>>, vector<1x8xf32>
    %137 = vector.broadcast %135 : vector<1x8xf32> to vector<8x8xf32>
    %138 = arith.addf %134, %137 : vector<8x8xf32>
    %cst_103 = arith.constant 0.353553385 : f32
    %139 = vector.broadcast %cst_103 : f32 to vector<8x8xf32>
    %140 = arith.mulf %138, %139 : vector<8x8xf32>
    %141 = arith.truncf %140 : vector<8x8xf32> to vector<8x8xbf16>
    %142 = vector.broadcast %136 : vector<1x8xf32> to vector<8x8xf32>
    %143 = arith.addf %134, %142 : vector<8x8xf32>
    %cst_104 = arith.constant 0.353553385 : f32
    %144 = vector.broadcast %cst_104 : f32 to vector<8x8xf32>
    %145 = arith.mulf %143, %144 : vector<8x8xf32>
    %146 = arith.mulf %145, %4 : vector<8x8xf32>
    %147 = arith.truncf %146 : vector<8x8xf32> to vector<8x8xbf16>
    %c0_105 = arith.constant 0 : index
    %c0_106 = arith.constant 0 : index
    %148 = vector.load %arg21[%c0_105, %c0_106] : memref<8x24xbf16, #tpu.memory_space<vmem>>, vector<8x8xbf16>
    tpu.vector_store %arg21[%c0_105, %c0_106], %147 {strides = array<i32>} : memref<8x24xbf16, #tpu.memory_space<vmem>>, vector<8x8xbf16>,
    %149 = arith.mulf %145, %5 : vector<8x8xf32>
    %150 = arith.truncf %149 : vector<8x8xf32> to vector<8x8xbf16>
    %c0_107 = arith.constant 0 : index
    %c8_108 = arith.constant 8 : index
    %151 = vector.load %arg21[%c0_107, %c8_108] : memref<8x24xbf16, #tpu.memory_space<vmem>>, vector<8x8xbf16>
    tpu.vector_store %arg21[%c0_107, %c8_108], %150 {strides = array<i32>} : memref<8x24xbf16, #tpu.memory_space<vmem>>, vector<8x8xbf16>,
    %c0_109 = arith.constant 0 : index
    %c16_110 = arith.constant 16 : index
    %152 = vector.load %arg21[%c0_109, %c16_110] : memref<8x24xbf16, #tpu.memory_space<vmem>>, vector<8x8xbf16>
    tpu.vector_store %arg21[%c0_109, %c16_110], %141 {strides = array<i32>} : memref<8x24xbf16, #tpu.memory_space<vmem>>, vector<8x8xbf16>,
    %c3_111 = arith.constant 3 : index
    %c0_112 = arith.constant 0 : index
    %c0_113 = arith.constant 0 : index
    %153 = vector.load %arg2[%c3_111, %c0_112, %c0_113] : memref<4x8x8xbf16, #tpu.memory_space<vmem>>, vector<1x8x8xbf16>
    %154 = vector.shape_cast %153 : vector<1x8x8xbf16> to vector<8x8xbf16>
    %c0_114 = arith.constant 0 : index
    %c16_115 = arith.constant 16 : index
    %155 = vector.load %arg22[%c0_114, %c16_115] : memref<8x24xbf16, #tpu.memory_space<vmem>>, vector<8x8xbf16>
    tpu.vector_store %arg22[%c0_114, %c16_115], %154 {strides = array<i32>} : memref<8x24xbf16, #tpu.memory_space<vmem>>, vector<8x8xbf16>,
    %c0_116 = arith.constant 0 : index
    %c0_117 = arith.constant 0 : index
    %156 = vector.load %arg21[%c0_116, %c0_117] : memref<8x24xbf16, #tpu.memory_space<vmem>>, vector<8x24xbf16>
    %c0_118 = arith.constant 0 : index
    %c0_119 = arith.constant 0 : index
    %157 = vector.load %arg22[%c0_118, %c0_119] : memref<8x24xbf16, #tpu.memory_space<vmem>>, vector<8x24xbf16>
    %cst_120 = arith.constant dense<0.000000e+00> : vector<8x8xf32>
    %158 = tpu.matmul %156, %157, %cst_120 {dimension_numbers = #tpu.dot_dimension_numbers<[1], [1], [0], [0], [0, 0, 1, 0], [], []>} : vector<8x24xbf16>, vector<8x24xbf16>, vector<8x8xf32> -> vector<8x8xf32>
    %cst_121 = arith.constant dense<0xFF800000> : vector<8xf32>
    %159 = vector.multi_reduction <maximumf>, %158, %cst_121 [1] : vector<8x8xf32> to vector<8xf32>
    %160 = vector.shape_cast %159 : vector<8xf32> to vector<8x1xf32>
    %161 = vector.broadcast %160 : vector<8x1xf32> to vector<8x8xf32>
    %162 = arith.subf %158, %161 : vector<8x8xf32>
    %163 = math.exp %162 : vector<8x8xf32>
    %cst_122 = arith.constant dense<0.000000e+00> : vector<8xf32>
    %164 = vector.multi_reduction <add>, %163, %cst_122 [1] : vector<8x8xf32> to vector<8xf32>
    %165 = vector.shape_cast %164 : vector<8xf32> to vector<8x1xf32>
    %166 = arith.truncf %163 : vector<8x8xf32> to vector<8x8xbf16>
    %c3_123 = arith.constant 3 : index
    %c0_124 = arith.constant 0 : index
    %c0_125 = arith.constant 0 : index
    %167 = vector.load %arg3[%c3_123, %c0_124, %c0_125] : memref<4x8x8xbf16, #tpu.memory_space<vmem>>, vector<1x8x8xbf16>
    %168 = vector.shape_cast %167 : vector<1x8x8xbf16> to vector<8x8xbf16>
    %cst_126 = arith.constant dense<0.000000e+00> : vector<8x8xf32>
    %169 = tpu.matmul %166, %168, %cst_126 {dimension_numbers = #tpu.dot_dimension_numbers<[1], [0], [0], [1], [0, 0, 1, 1], [], []>} : vector<8x8xbf16>, vector<8x8xbf16>, vector<8x8xf32> -> vector<8x8xf32>
    %cst_127 = arith.constant 1.000000e+00 : f32
    %170 = vector.broadcast %cst_127 : f32 to vector<8x1xf32>
    %171 = arith.divf %170, %165 : vector<8x1xf32>
    %172 = vector.broadcast %171 : vector<8x1xf32> to vector<8x8xf32>
    %173 = arith.mulf %169, %172 : vector<8x8xf32>
    %174 = arith.truncf %173 : vector<8x8xf32> to vector<8x8xbf16>
    %c0_128 = arith.constant 0 : index
    %c24 = arith.constant 24 : index
    %175 = vector.load %arg23[%c0_128, %c24] : memref<8x32xbf16, #tpu.memory_space<vmem>>, vector<8x8xbf16>
    tpu.vector_store %arg23[%c0_128, %c24], %174 {strides = array<i32>} : memref<8x32xbf16, #tpu.memory_space<vmem>>, vector<8x8xbf16>,
    %c0_129 = arith.constant 0 : index
    %c0_130 = arith.constant 0 : index
    %176 = vector.load %arg23[%c0_129, %c0_130] : memref<8x32xbf16, #tpu.memory_space<vmem>>, vector<8x32xbf16>
    %c0_131 = arith.constant 0 : index
    %c0_132 = arith.constant 0 : index
    %177 = vector.load %arg10[%c0_131, %c0_132] : memref<32x32xbf16, #tpu.memory_space<vmem>>, vector<32x32xbf16>
    %cst_133 = arith.constant dense<0.000000e+00> : vector<8x32xf32>
    %178 = tpu.matmul %176, %177, %cst_133 {dimension_numbers = #tpu.dot_dimension_numbers<[1], [0], [0], [1], [0, 0, 1, 1], [], []>} : vector<8x32xbf16>, vector<32x32xbf16>, vector<8x32xf32> -> vector<8x32xf32>
    %c0_134 = arith.constant 0 : index
    %c0_135 = arith.constant 0 : index
    %179 = vector.load %arg11[%c0_134, %c0_135] : memref<1x32xf32, #tpu.memory_space<vmem>>, vector<1x32xf32>
    %180 = vector.broadcast %179 : vector<1x32xf32> to vector<8x32xf32>
    %181 = arith.addf %178, %180 : vector<8x32xf32>
    %182 = arith.addf %181, %0 : vector<8x32xf32>
    %c0_136 = arith.constant 0 : index
    %c0_137 = arith.constant 0 : index
    %183 = vector.load %arg12[%c0_136, %c0_137] : memref<1x32xf32, #tpu.memory_space<vmem>>, vector<1x32xf32>
    %c0_138 = arith.constant 0 : index
    %c0_139 = arith.constant 0 : index
    %184 = vector.load %arg13[%c0_138, %c0_139] : memref<1x32xf32, #tpu.memory_space<vmem>>, vector<1x32xf32>
    %cst_140 = arith.constant dense<0.000000e+00> : vector<8xf32>
    %185 = vector.multi_reduction <add>, %182, %cst_140 [1] : vector<8x32xf32> to vector<8xf32>
    %186 = vector.shape_cast %185 : vector<8xf32> to vector<8x1xf32>
    %cst_141 = arith.constant 3.200000e+01 : f32
    %187 = vector.broadcast %cst_141 : f32 to vector<8x1xf32>
    %188 = arith.divf %186, %187 : vector<8x1xf32>
    %189 = vector.broadcast %188 : vector<8x1xf32> to vector<8x32xf32>
    %190 = arith.subf %182, %189 : vector<8x32xf32>
    %191 = arith.mulf %190, %190 : vector<8x32xf32>
    %cst_142 = arith.constant dense<0.000000e+00> : vector<8xf32>
    %192 = vector.multi_reduction <add>, %191, %cst_142 [1] : vector<8x32xf32> to vector<8xf32>
    %193 = vector.shape_cast %192 : vector<8xf32> to vector<8x1xf32>
    %cst_143 = arith.constant 3.200000e+01 : f32
    %194 = vector.broadcast %cst_143 : f32 to vector<8x1xf32>
    %195 = arith.divf %193, %194 : vector<8x1xf32>
    %196 = vector.broadcast %188 : vector<8x1xf32> to vector<8x32xf32>
    %197 = arith.subf %182, %196 : vector<8x32xf32>
    %cst_144 = arith.constant 9.99999974E-6 : f32
    %198 = vector.broadcast %cst_144 : f32 to vector<8x1xf32>
    %199 = arith.addf %195, %198 : vector<8x1xf32>
    %200 = math.rsqrt %199 : vector<8x1xf32>
    %201 = vector.broadcast %200 : vector<8x1xf32> to vector<8x32xf32>
    %202 = arith.mulf %197, %201 : vector<8x32xf32>
    %203 = vector.broadcast %183 : vector<1x32xf32> to vector<8x32xf32>
    %204 = arith.mulf %202, %203 : vector<8x32xf32>
    %205 = vector.broadcast %184 : vector<1x32xf32> to vector<8x32xf32>
    %206 = arith.addf %204, %205 : vector<8x32xf32>
    %207 = arith.truncf %206 : vector<8x32xf32> to vector<8x32xbf16>
    %c0_145 = arith.constant 0 : index
    %c0_146 = arith.constant 0 : index
    %208 = vector.load %arg14[%c0_145, %c0_146] : memref<32x128xbf16, #tpu.memory_space<vmem>>, vector<32x128xbf16>
    %cst_147 = arith.constant dense<0.000000e+00> : vector<8x128xf32>
    %209 = tpu.matmul %207, %208, %cst_147 {dimension_numbers = #tpu.dot_dimension_numbers<[1], [0], [0], [1], [0, 0, 1, 1], [], []>} : vector<8x32xbf16>, vector<32x128xbf16>, vector<8x128xf32> -> vector<8x128xf32>
    %c0_148 = arith.constant 0 : index
    %c0_149 = arith.constant 0 : index
    %210 = vector.load %arg15[%c0_148, %c0_149] : memref<1x128xf32, #tpu.memory_space<vmem>>, vector<1x128xf32>
    %211 = vector.broadcast %210 : vector<1x128xf32> to vector<8x128xf32>
    %212 = arith.addf %209, %211 : vector<8x128xf32>
    %cst_150 = arith.constant 0.000000e+00 : f32
    %213 = vector.broadcast %cst_150 : f32 to vector<8x128xf32>
    %214 = arith.cmpf ogt, %212, %213 : vector<8x128xf32>
    %cst_151 = arith.constant 0.000000e+00 : f32
    %215 = vector.broadcast %cst_151 : f32 to vector<8x128xf32>
    %216 = arith.minimumf %212, %215 : vector<8x128xf32>
    %217 = math.exp %216 : vector<8x128xf32>
    %cst_152 = arith.constant 1.000000e+00 : f32
    %218 = vector.broadcast %cst_152 : f32 to vector<8x128xf32>
    %219 = arith.subf %217, %218 : vector<8x128xf32>
    %220 = arith.select %214, %212, %219 : vector<8x128xi1>, vector<8x128xf32>
    %221 = arith.truncf %220 : vector<8x128xf32> to vector<8x128xbf16>
    %c0_153 = arith.constant 0 : index
    %c0_154 = arith.constant 0 : index
    %222 = vector.load %arg16[%c0_153, %c0_154] : memref<128x32xbf16, #tpu.memory_space<vmem>>, vector<128x32xbf16>
    %cst_155 = arith.constant dense<0.000000e+00> : vector<8x32xf32>
    %223 = tpu.matmul %221, %222, %cst_155 {dimension_numbers = #tpu.dot_dimension_numbers<[1], [0], [0], [1], [0, 0, 1, 1], [], []>} : vector<8x128xbf16>, vector<128x32xbf16>, vector<8x32xf32> -> vector<8x32xf32>
    %c0_156 = arith.constant 0 : index
    %c0_157 = arith.constant 0 : index
    %224 = vector.load %arg17[%c0_156, %c0_157] : memref<1x32xf32, #tpu.memory_space<vmem>>, vector<1x32xf32>
    %225 = vector.broadcast %224 : vector<1x32xf32> to vector<8x32xf32>
    %226 = arith.addf %223, %225 : vector<8x32xf32>
    %227 = arith.addf %226, %206 : vector<8x32xf32>
    %c0_158 = arith.constant 0 : index
    %c0_159 = arith.constant 0 : index
    %228 = vector.load %arg18[%c0_158, %c0_159] : memref<1x32xf32, #tpu.memory_space<vmem>>, vector<1x32xf32>
    %c0_160 = arith.constant 0 : index
    %c0_161 = arith.constant 0 : index
    %229 = vector.load %arg19[%c0_160, %c0_161] : memref<1x32xf32, #tpu.memory_space<vmem>>, vector<1x32xf32>
    %cst_162 = arith.constant dense<0.000000e+00> : vector<8xf32>
    %230 = vector.multi_reduction <add>, %227, %cst_162 [1] : vector<8x32xf32> to vector<8xf32>
    %231 = vector.shape_cast %230 : vector<8xf32> to vector<8x1xf32>
    %cst_163 = arith.constant 3.200000e+01 : f32
    %232 = vector.broadcast %cst_163 : f32 to vector<8x1xf32>
    %233 = arith.divf %231, %232 : vector<8x1xf32>
    %234 = vector.broadcast %233 : vector<8x1xf32> to vector<8x32xf32>
    %235 = arith.subf %227, %234 : vector<8x32xf32>
    %236 = arith.mulf %235, %235 : vector<8x32xf32>
    %cst_164 = arith.constant dense<0.000000e+00> : vector<8xf32>
    %237 = vector.multi_reduction <add>, %236, %cst_164 [1] : vector<8x32xf32> to vector<8xf32>
    %238 = vector.shape_cast %237 : vector<8xf32> to vector<8x1xf32>
    %cst_165 = arith.constant 3.200000e+01 : f32
    %239 = vector.broadcast %cst_165 : f32 to vector<8x1xf32>
    %240 = arith.divf %238, %239 : vector<8x1xf32>
    %241 = vector.broadcast %233 : vector<8x1xf32> to vector<8x32xf32>
    %242 = arith.subf %227, %241 : vector<8x32xf32>
    %cst_166 = arith.constant 9.99999974E-6 : f32
    %243 = vector.broadcast %cst_166 : f32 to vector<8x1xf32>
    %244 = arith.addf %240, %243 : vector<8x1xf32>
    %245 = math.rsqrt %244 : vector<8x1xf32>
    %246 = vector.broadcast %245 : vector<8x1xf32> to vector<8x32xf32>
    %247 = arith.mulf %242, %246 : vector<8x32xf32>
    %248 = vector.broadcast %228 : vector<1x32xf32> to vector<8x32xf32>
    %249 = arith.mulf %247, %248 : vector<8x32xf32>
    %250 = vector.broadcast %229 : vector<1x32xf32> to vector<8x32xf32>
    %251 = arith.addf %249, %250 : vector<8x32xf32>
    %c0_167 = arith.constant 0 : index
    %c0_168 = arith.constant 0 : index
    %252 = vector.load %arg20[%c0_167, %c0_168] : memref<8x32xf32, #tpu.memory_space<vmem>>, vector<8x32xf32>
    tpu.vector_store %arg20[%c0_167, %c0_168], %251 {strides = array<i32>} : memref<8x32xf32, #tpu.memory_space<vmem>>, vector<8x32xf32>,
    return
  }
  func.func @transform_0(%arg0: i32) -> (i32, i32) {
    %c0_i32 = arith.constant 0 : i32
    %c0_i32_0 = arith.constant 0 : i32
    return %arg0, %c0_i32 : i32, i32
  }
  func.func @transform_1(%arg0: i32) -> (i32, i32, i32) {
    %c0_i32 = arith.constant 0 : i32
    %c0_i32_0 = arith.constant 0 : i32
    %c0_i32_1 = arith.constant 0 : i32
    %c0_i32_2 = arith.constant 0 : i32
    return %c0_i32, %c0_i32_0, %c0_i32_1 : i32, i32, i32
  }
  func.func @transform_2(%arg0: i32) -> (i32, i32, i32) {
    %c0_i32 = arith.constant 0 : i32
    %c0_i32_0 = arith.constant 0 : i32
    %c0_i32_1 = arith.constant 0 : i32
    %c0_i32_2 = arith.constant 0 : i32
    return %c0_i32, %c0_i32_0, %c0_i32_1 : i32, i32, i32
  }
  func.func @transform_3(%arg0: i32) -> (i32, i32) {
    %c0_i32 = arith.constant 0 : i32
    %c0_i32_0 = arith.constant 0 : i32
    return %arg0, %c0_i32 : i32, i32
  }
  func.func @transform_4(%arg0: i32) -> (i32, i32) {
    %c0_i32 = arith.constant 0 : i32
    %c0_i32_0 = arith.constant 0 : i32
    return %arg0, %c0_i32 : i32, i32
  }
  func.func @transform_5(%arg0: i32) -> (i32, i32) {
    %c0_i32 = arith.constant 0 : i32
    %c0_i32_0 = arith.constant 0 : i32
    %c0_i32_1 = arith.constant 0 : i32
    return %c0_i32, %c0_i32_0 : i32, i32
  }
  func.func @transform_6(%arg0: i32) -> (i32, i32) {
    %c0_i32 = arith.constant 0 : i32
    %c0_i32_0 = arith.constant 0 : i32
    %c0_i32_1 = arith.constant 0 : i32
    return %c0_i32, %c0_i32_0 : i32, i32
  }
  func.func @transform_7(%arg0: i32) -> (i32, i32) {
    %c0_i32 = arith.constant 0 : i32
    %c0_i32_0 = arith.constant 0 : i32
    %c0_i32_1 = arith.constant 0 : i32
    return %c0_i32, %c0_i32_0 : i32, i32
  }
  func.func @transform_8(%arg0: i32) -> (i32, i32) {
    %c0_i32 = arith.constant 0 : i32
    %c0_i32_0 = arith.constant 0 : i32
    %c0_i32_1 = arith.constant 0 : i32
    return %c0_i32, %c0_i32_0 : i32, i32
  }
  func.func @transform_9(%arg0: i32) -> (i32, i32) {
    %c0_i32 = arith.constant 0 : i32
    %c0_i32_0 = arith.constant 0 : i32
    %c0_i32_1 = arith.constant 0 : i32
    return %c0_i32, %c0_i32_0 : i32, i32
  }
  func.func @transform_10(%arg0: i32) -> (i32, i32) {
    %c0_i32 = arith.constant 0 : i32
    %c0_i32_0 = arith.constant 0 : i32
    %c0_i32_1 = arith.constant 0 : i32
    return %c0_i32, %c0_i32_0 : i32, i32
  }
  func.func @transform_11(%arg0: i32) -> (i32, i32) {
    %c0_i32 = arith.constant 0 : i32
    %c0_i32_0 = arith.constant 0 : i32
    %c0_i32_1 = arith.constant 0 : i32
    return %c0_i32, %c0_i32_0 : i32, i32
  }
  func.func @transform_12(%arg0: i32) -> (i32, i32) {
    %c0_i32 = arith.constant 0 : i32
    %c0_i32_0 = arith.constant 0 : i32
    %c0_i32_1 = arith.constant 0 : i32
    return %c0_i32, %c0_i32_0 : i32, i32
  }
  func.func @transform_13(%arg0: i32) -> (i32, i32) {
    %c0_i32 = arith.constant 0 : i32
    %c0_i32_0 = arith.constant 0 : i32
    %c0_i32_1 = arith.constant 0 : i32
    return %c0_i32, %c0_i32_0 : i32, i32
  }
  func.func @transform_14(%arg0: i32) -> (i32, i32) {
    %c0_i32 = arith.constant 0 : i32
    %c0_i32_0 = arith.constant 0 : i32
    %c0_i32_1 = arith.constant 0 : i32
    return %c0_i32, %c0_i32_0 : i32, i32
  }
  func.func @transform_15(%arg0: i32) -> (i32, i32) {
    %c0_i32 = arith.constant 0 : i32
    %c0_i32_0 = arith.constant 0 : i32
    %c0_i32_1 = arith.constant 0 : i32
    return %c0_i32, %c0_i32_0 : i32, i32
  }
  func.func @transform_16(%arg0: i32) -> (i32, i32) {
    %c0_i32 = arith.constant 0 : i32
    %c0_i32_0 = arith.constant 0 : i32
    %c0_i32_1 = arith.constant 0 : i32
    return %c0_i32, %c0_i32_0 : i32, i32
  }
  func.func @transform_17(%arg0: i32) -> (i32, i32) {
    %c0_i32 = arith.constant 0 : i32
    %c0_i32_0 = arith.constant 0 : i32
    %c0_i32_1 = arith.constant 0 : i32
    return %c0_i32, %c0_i32_0 : i32, i32
  }
  func.func @transform_18(%arg0: i32) -> (i32, i32) {
    %c0_i32 = arith.constant 0 : i32
    %c0_i32_0 = arith.constant 0 : i32
    %c0_i32_1 = arith.constant 0 : i32
    return %c0_i32, %c0_i32_0 : i32, i32
  }
  func.func @transform_19(%arg0: i32) -> (i32, i32) {
    %c0_i32 = arith.constant 0 : i32
    %c0_i32_0 = arith.constant 0 : i32
    return %arg0, %c0_i32 : i32, i32
  }
}

</mosaic_0001>

<bundles_post_ra>
// kernel: transformer_block.2
= control target key start
LH: loop header
LB: loop body
LE: loop exit
PB: predicated region body
PF: predicated region fallthrough
CT: control target
= control target key end

     0   :  { %11 = vsyncpa [#allocation3], 0  ;;  %s434_s0 = inlined_call_operand.hbm [shape: f32[8,32], index: 0, kind: input, shape index: {}]   ;;  %s435_s1 = inlined_call_operand.hbm [shape: f32[8,32], index: 1, kind: input, shape index: {}]   ;;  %s436_s2 = inlined_call_operand.vmem [shape: bf16[32,32], index: 2, kind: input, shape index: {}]   ;;  %s437_s3 = inlined_call_operand.hbm [shape: bf16[32,32], index: 3, kind: input, shape index: {}]   ;;  %s438_s4 = inlined_call_operand.vmem [shape: bf16[4,8,8], index: 4, kind: output, shape index: {0}]   ;;  %s439_s5 = inlined_call_operand.vmem [shape: bf16[4,8,8], index: 5, kind: output, shape index: {1}]  }
   0x1   :  { %12 = vsyncpa [#allocation5], 0  ;;  %s347_s18 = smov [#allocation4]   ;;  %s348_s20 = smov [#allocation2]  }
   0x2   :  { %s29_s19 = sshll.u32 %s347_s18, 4  ;;  %s19_s21 = sshll.u32 %s348_s20, 4  ;;  %s30_s19 = int_to_ptr.vmem [resolvable:$true] %s29_s19  ;;  %s20_s21 = int_to_ptr.vmem [resolvable:$true] %s19_s21 }
   0x3   :  { %s291_s22 = scalar_lea.vmem %s30_s19, 128  ;;  %p296_p1 = scmp.lt.s32.totalorder %s30_s19, %s30_s19 }
   0x4   :  { %p292_p0 = scmp.ne.s32.totalorder %s30_s19, %s291_s22  ;;  %p297_p2 = scmp.lt.s32.totalorder %s291_s22, %s291_s22 }
   0x6   :  { %p298_p3 = por %p297_p2, %p296_p1 }
   0x8   :  { %p299_p4 = pnand %p298_p3, %p292_p0 }
   0xa   :  { %302 = shalt.err (!%p299_p4)
}
   0xb   :  { %32 = dma.hbm_to_vmem [thread:$0]  %s435_s1, 128, %s30_s19, [#allocation5]  }
   0xc   :  { %s311_s25 = scalar_lea.vmem %s20_s21, 128  ;;  %p316_p6 = scmp.lt.s32.totalorder %s20_s21, %s20_s21 }
   0xd   :  { %p312_p5 = scmp.ne.s32.totalorder %s20_s21, %s311_s25  ;;  %p317_p7 = scmp.lt.s32.totalorder %s311_s25, %s311_s25 }
   0xf   :  { %p318_p8 = por %p317_p7, %p316_p6 }
  0x11   :  { %p319_p9 = pnand %p318_p8, %p312_p5 }
  0x13   :  { %322 = shalt.err (!%p319_p9)
}
  0x14   :  { %22 = dma.hbm_to_vmem [thread:$0]  %s434_s0, 128, %s20_s21, [#allocation3]  }
  0x15   :  { %s349_s28 = smov [#allocation6]  }
  0x16   :  { %s40_s29 = sshll.u32 %s349_s28, 4  ;;  %s41_s29 = int_to_ptr.vmem [resolvable:$true] %s40_s29 }
  0x17   :  { %s331_s30 = scalar_lea.vmem %s41_s29, 256  ;;  %p336_p11 = scmp.lt.s32.totalorder %s41_s29, %s41_s29 }
  0x18   :  { %p332_p10 = scmp.ne.s32.totalorder %s41_s29, %s331_s30  ;;  %p337_p12 = scmp.lt.s32.totalorder %s331_s30, %s331_s30 }
  0x1a   :  { %p338_p13 = por %p337_p12, %p336_p11 }
  0x1c   :  { %p339_p0 = pnand %p338_p13, %p332_p10 }
  0x1e   :  { %342 = shalt.err (!%p339_p0)
}
  0x1f   :  { %s350_s1 = smov 64   ;;  %s351_s6 = smov 4  }
  0x20   :  { %46 = dma.hbm_to_vmem [thread:$0]  %s437_s3, 256, %s41_s29, [#allocation5], %s350_s1, %s350_s1, %s351_s6  }
  0x21   :  { %343 = dma.done.wait [#allocation3], 128  }
  0x22   :  { %344 = vsyncadd [#allocation3], 4294967168 }
  0x23   :  { %345 = dma.done.wait [#allocation5], 384  }
  0x24   :  { %346 = vsyncadd [#allocation5], 4294966912  ;;  %v352_v0 = vmov 0.0   ;;  %vm353_vm0 = vmmov 0   ;;  %v279_v1 = vld [vmem:[%s436_s2 + $0x8] sm:$0xff]   ;;  %v281_v3 = vld [vmem:[%s436_s2] sm:$0xff]  }
  0x25   :  { %253 = vmatprep.subr.bf16.mxu0 %v352_v0  ;;  %261 = vmatprep.subr.bf16.mxu1 %v352_v0  ;;  %v280_v2 = vld [vmem:[#allocation6 + $0x8] sm:$0xff]   ;;  %v282_v4 = vld [vmem:[#allocation6] sm:$0xff]   ;;  %v57_v5 = vld [vmem:[#allocation2] sm:$0xff]  ;;  %vm75_vm1 = vcmask 261120   ;;  %vm181_vm2 = vcmask 60416   ;;  %s354_s12 = smov 112  }
  0x26   :  { %257 = vmatprep.mubr.msk.bf16.mxu0 %vm353_vm0, %v352_v0  ;;  %265 = vmatprep.mubr.msk.bf16.mxu1 %vm353_vm0, %v352_v0  ;;  %v119_v6 = vld [vmem:[#allocation4] sm:$0xff]  ;;  %v58_v7 = vpack.c.bf16 %v57_v5, %v57_v5  ;;  %s355_s13 = smov 120   ;;  %s356_s16 = smov 104  }
  0x27   :  { %254 = vmatpush3.bf16.msra.mxu0 %v279_v1  ;;  %262 = vmatpush3.bf16.msra.mxu1 %v280_v2  ;;  %v120_v8 = vpack.c.bf16 %v119_v6, %v119_v6 }
  0x28   :  { %255 = vmatprep.subr.bf16.mxu0 %v352_v0  ;;  %263 = vmatprep.subr.bf16.mxu1 %v352_v0 }
  0x2b   :  { %256 = vmatpush3.bf16.msra.mxu0 %v281_v3  ;;  %264 = vmatpush3.bf16.msra.mxu1 %v282_v4 }
  0x2e   :  { %258 = vmatmul.mubr.msk.bf16.vlgmr.msra.gmra.mxu0 %vm75_vm1, %v58_v7  ;;  %266 = vmatmul.mubr.msk.bf16.vlgmr.msra.gmra.mxu1 %vm75_vm1, %v120_v8 }
  0xee   :  { %v113_v9 = vpop.f32.mrf.mxu0  ;;  %v174_v11 = vpop.f32.mrf.mxu1 }
  0xef   :  { %v180_v10 = vpack.c.bf16 %v113_v9, %v113_v9  ;;  %v183_v12 = vpack.c.bf16 %v174_v11, %v174_v11 }
  0xf0   :  { %v259_v13 = vpop.f32.mrf.mxu0  ;;  %v267_v14 = vpop.f32.mrf.mxu1 }
  0xf1   :  { %182 = vst.msk [vmem:[%s438_s4] sm:$0xf] %vm181_vm2, %v180_v10  ;;  %201 = vrot.lane.b32.xlu1 %v180_v10, %s354_s12  ;;  %188 = vrot.lane.b32.xlu0 %v180_v10, %s355_s13  ;;  %184 = vst.msk [vmem:[%s439_s5] sm:$0xf] %vm181_vm2, %v183_v12 }
  0xf2   :  { %v116_v15 = vpop.f32.mrf.mxu0  ;;  %v177_v16 = vpop.f32.mrf.mxu1 }
  0xf4   :  { %v260_v17 = vpop.f32.mrf.mxu0  ;;  %v268_v18 = vpop.f32.mrf.mxu1 }
  0xf5   :  { %206 = vrot.lane.b32.xlu1 %v183_v12, %s354_s12  ;;  %196 = vrot.lane.b32.xlu0 %v183_v12, %s355_s13 }
  0xf9   :  { %216 = vrot.lane.b32.xlu1 %v183_v12, %s356_s16  ;;  %211 = vrot.lane.b32.xlu0 %v180_v10, %s356_s16 }
 0x163   :  { %v202_v19 = vpop.permute.xlu1 %201  ;;  %v189_v20 = vpop.permute.xlu0 %188 }
 0x164   :  { %241 = vst.msk [vmem:[%s438_s4 + $0x8] sm:$0xf] %vm181_vm2, %v202_v19  ;;  %238 = vst.msk [vmem:[%s438_s4 + $0x4] sm:$0xf] %vm181_vm2, %v189_v20 }
 0x167   :  { %v207_v21 = vpop.permute.xlu1 %206  ;;  %v197_v22 = vpop.permute.xlu0 %196 }
 0x168   :  { %242 = vst.msk [vmem:[%s439_s5 + $0x8] sm:$0xf] %vm181_vm2, %v207_v21  ;;  %240 = vst.msk [vmem:[%s439_s5 + $0x4] sm:$0xf] %vm181_vm2, %v197_v22 }
 0x16b   :  { %v217_v23 = vpop.permute.xlu1 %216  ;;  %v212_v24 = vpop.permute.xlu0 %211 }
 0x16c   :  { %244 = vst.msk [vmem:[%s439_s5 + $0xc] sm:$0xf] %vm181_vm2, %v217_v23  ;;  %243 = vst.msk [vmem:[%s438_s4 + $0xc] sm:$0xf] %vm181_vm2, %v212_v24 }
 0x16d   :  { %229 = vsyncpa [#allocation3], 1 }
 0x16e   :  { %230 = vsyncpa [#allocation5], 1 }

// kernel: transformer_block.3
= control target key start
LH: loop header
LB: loop body
LE: loop exit
PB: predicated region body
PF: predicated region fallthrough
CT: control target
= control target key end

     0   :  { %s1785_s0 = inlined_call_operand.vmem [shape: f32[8,32], index: 0, kind: input, shape index: {}]   ;;  %s1786_s1 = inlined_call_operand.vmem [shape: bf16[4,8,8], index: 1, kind: input, shape index: {}]   ;;  %s1787_s2 = inlined_call_operand.vmem [shape: bf16[4,8,8], index: 2, kind: input, shape index: {}]   ;;  %s1788_s3 = inlined_call_operand.vmem [shape: f32[8,8], index: 3, kind: input, shape index: {}]   ;;  %s1789_s4 = inlined_call_operand.vmem [shape: f32[8,8], index: 4, kind: input, shape index: {}]   ;;  %s1790_s5 = inlined_call_operand.vmem [shape: bf16[8,16], index: 5, kind: input, shape index: {}]   ;;  %s1791_s6 = inlined_call_operand.vmem [shape: bf16[32,32], index: 6, kind: input, shape index: {}]   ;;  %s1792_s7 = inlined_call_operand.vmem [shape: f32[4,8], index: 7, kind: input, shape index: {}]   ;;  %s1793_s8 = inlined_call_operand.vmem [shape: f32[4,8], index: 8, kind: input, shape index: {}]   ;;  %s1794_s9 = inlined_call_operand.vmem [shape: bf16[32,32], index: 9, kind: input, shape index: {}]   ;;  %s1795_s10 = inlined_call_operand.vmem [shape: f32[1,32], index: 10, kind: input, shape index: {}]   ;;  %s1796_s11 = inlined_call_operand.vmem [shape: f32[1,32], index: 11, kind: input, shape index: {}]   ;;  %s1797_s12 = inlined_call_operand.vmem [shape: f32[1,32], index: 12, kind: input, shape index: {}]   ;;  %s1798_s13 = inlined_call_operand.vmem [shape: bf16[32,128], index: 13, kind: input, shape index: {}]   ;;  %s1799_s14 = inlined_call_operand.vmem [shape: f32[1,128], index: 14, kind: input, shape index: {}]   ;;  %s1800_s15 = inlined_call_operand.vmem [shape: bf16[128,32], index: 15, kind: input, shape index: {}]   ;;  %s1801_s16 = inlined_call_operand.vmem [shape: f32[1,32], index: 16, kind: input, shape index: {}]   ;;  %s1802_s17 = inlined_call_operand.vmem [shape: f32[1,32], index: 17, kind: input, shape index: {}]   ;;  %s1803_s18 = inlined_call_operand.vmem [shape: f32[1,32], index: 18, kind: input, shape index: {}]   ;;  %s1804_s19 = inlined_call_operand.hbm [shape: f32[8,32], index: 19, kind: output, shape index: {}]  }
   0x1   :  { %1807 = sst [smem:[#allocation8_spill]] %s1785_s0 }
   0x2   :  { %1808 = sst [smem:[#allocation9_spill]] %s1786_s1 }
   0x3   :  { %1809 = sst [smem:[#allocation10_spill]] %s1787_s2 }
   0x4   :  { %1810 = sst [smem:[#allocation11_spill]] %s1788_s3 }
   0x5   :  { %v1346_v0 = vld [vmem:[%s1791_s6 + $0x8] sm:$0xff]   ;;  %v1404_v1 = vmov 0.0   ;;  %v1347_v2 = vld [vmem:[%s1791_s6] sm:$0xff]   ;;  %vm1405_vm0 = vmmov 0   ;;  %s1811_s2 = sld [smem:[#allocation8_spill]]  ;;  %vm82_vm1 = vcmask 261120  }
   0x6   :  { %1245 = vmatprep.subr.bf16.mxu0 %v1404_v1  ;;  %1265 = vmatprep.subr.bf16.mxu1 %v1404_v1  ;;  %v1150_v4 = vld [vmem:[%s1793_s8 + $0x1] ss:$0 sm:$0xff]  ;;  %s1812_s26 = sld [smem:[#allocation11_spill]]  ;;  %s1406_s6 = smov 8   ;;  %v1159_v7 = vld [vmem:[%s1793_s8 + $0x2] ss:$0 sm:$0xff] }
   0x7   :  { %1246 = vmatpush3.bf16.msra.mxu0 %v1346_v0  ;;  %1249 = vmatprep.mubr.msk.bf16.mxu0 %vm1405_vm0, %v1404_v1  ;;  %v1149_v6 = vld [vmem:[%s1792_s7 + $0x1] ss:$0 sm:$0xff]  ;;  %s1407_s21 = smov 16   ;;  %v1168_v10 = vld [vmem:[%s1793_s8 + $0x3] ss:$0 sm:$0xff] }
   0x8   :  { %1247 = vmatprep.subr.bf16.mxu0 %v1404_v1  ;;  %305 = vrot.lane.b32.xlu0 %v1150_v4, %s1406_s6  ;;  %v1554_v9 = vld [vmem:[%s1789_s4] sm:$0xff] }
   0x9   :  { %1267 = vmatprep.mubr.msk.bf16.mxu1 %vm1405_vm0, %v1404_v1  ;;  %v1167_v11 = vld [vmem:[%s1792_s7 + $0x3] ss:$0 sm:$0xff] }
   0xb   :  { %v1526_v3 = vld [vmem:[%s1811_s2] sm:$0xff]  ;;  %1248 = vmatpush3.bf16.msra.mxu0 %v1347_v2 }
   0xc   :  { %v1534_v5 = vld [vmem:[%s1812_s26] sm:$0xff]  ;;  %v65_v8 = vpack.c.bf16 %v1526_v3, %v1526_v3  ;;  %294 = vrot.lane.b32.xlu0 %v1149_v6, %s1406_s6  ;;  %1253 = vmatprep.subr.bf16.mxu0 %v1404_v1 }
   0xd   :  { %311 = vrot.lane.b32.xlu1 %v1534_v5, %s1406_s6 }
   0xe   :  { %1250 = vmatmul.mubr.msk.bf16.vlgmr.msra.gmra.mxu0 %vm82_vm1, %v65_v8 }
   0xf   :  { %1255 = vmatprep.mubr.msk.bf16.mxu0 %vm1405_vm0, %v1404_v1 }
  0x10   :  { %484 = vrot.lane.b32.xlu0 %v1534_v5, %s1407_s21 }
  0x11   :  { %479 = vrot.lane.b32.xlu1 %v1159_v7, %s1407_s21 }
  0x15   :  { %496 = vrot.lane.b32.xlu1 %v1554_v9, %s1407_s21 }
  0x16   :  { %24 = vsyncpa [#allocation6], 0  ;;  %s1408_s23 = smov 24   ;;  %s1813_s3 = sld [smem:[#allocation9_spill]]  ;;  %v128_v13 = vld [vmem:[%s1790_s5] sm:$0xf] }
  0x17   :  { %651 = vrot.lane.b32.xlu0 %v1168_v10, %s1408_s23  ;;  %vm129_vm2 = vcmask 125952   ;;  %vm166_vm3 = vcmask 191616   ;;  %v1143_v21 = vld [vmem:[%s1792_s7] ss:$0 sm:$0xff]  ;;  %vm176_vm4 = vcmask 195584   ;;  %vm148_vm5 = vcmask 60416  }
  0x18   :  { %130 = vst.msk [vmem:[#allocation3] sm:$0xf] %vm129_vm2, %v128_v13  ;;  %v1144_v22 = vld [vmem:[%s1793_s8] ss:$0 sm:$0xff]  ;;  %s1409_s22 = smov 120   ;;  %s1410_s24 = smov 112  }
  0x19   :  { %640 = vrot.lane.b32.xlu1 %v1167_v11, %s1408_s23  ;;  %v1158_v55 = vld [vmem:[%s1792_s7 + $0x2] ss:$0 sm:$0xff]  ;;  %s1411_s7 = smov 104   ;;  %vm158_vm6 = vcmask 126016   ;;  %vm223_vm7 = vcmask 64512   ;;  %s1814_s28 = sld [smem:[#allocation10_spill]] }
  0x1a   :  { %vm238_vm8 = vcmask 1043456   ;;  %vm810_vm9 = vcmask 257216   ;;  %s1412_s25 = smov [#allocation5]  }
  0x1b   :  { %656 = vrot.lane.b32.xlu0 %v1534_v5, %s1408_s23  ;;  %s1132_s26 = sshll.u32 %s1412_s25, 4  ;;  %s1133_s26 = int_to_ptr.vmem [resolvable:$true] %s1132_s26 }
  0x1c   :  { %v168_v12 = vld [vmem:[%s1813_s3] sm:$0xf]  ;;  %v1153_v40 = vld [vmem:[%s1813_s3 + $0x4] sm:$0xf]  ;;  %v1162_v51 = vld [vmem:[%s1813_s3 + $0x8] sm:$0xf]  ;;  %p1387_p1 = scmp.lt.s32.totalorder %s1133_s26, %s1133_s26 }
  0x1d   :  { %668 = vrot.lane.b32.xlu1 %v1554_v9, %s1408_s23  ;;  %v1172_v0 = vld [vmem:[%s1813_s3 + $0xc] sm:$0xf] }
  0x1f   :  { %170 = vrot.lane.b32.xlu0 %v168_v12, %s1407_s21 }
  0x7a   :  { %v306_v14 = vpop.permute.xlu0 %305 }
  0x7e   :  { %v295_v15 = vpop.permute.xlu0 %294 }
  0x7f   :  { %v312_v24 = vpop.permute.xlu1 %311 }
  0x82   :  { %v485_v16 = vpop.permute.xlu0 %484 }
  0x83   :  { %v480_v36 = vpop.permute.xlu1 %479 }
  0x87   :  { %v497_v46 = vpop.permute.xlu1 %496 }
  0x89   :  { %v652_v17 = vpop.permute.xlu0 %651 }
  0x8b   :  { %v641_v54 = vpop.permute.xlu1 %640 }
  0x8d   :  { %v657_v18 = vpop.permute.xlu0 %656 }
  0x8f   :  { %v669_v61 = vpop.permute.xlu1 %668 }
  0x91   :  { %v171_v19 = vpop.permute.xlu0 %170 }
  0x92   :  { %173 = vst.msk [vmem:[#allocation3] sm:$0xf] %vm166_vm3, %v171_v19 }
  0x99   :  { %v175_v20 = vld [vmem:[#allocation3] sm:$0xf] }
  0x9a   :  { %v181_v23 = vsel %vm176_vm4, %v175_v20, 0 }
  0x9b   :  { %1254 = vmatpush3.bf16.xpose.msra.mxu0 %v181_v23 }
  0x9c   :  { %1259 = vmatprep.subr.bf16.mxu0 %v1404_v1 }
  0xce   :  { %v1592_v25 = vpop.f32.mrf.mxu0 }
  0xcf   :  { %v137_v26 = vadd.f32 %v1143_v21, %v1592_v25  ;;  %v144_v27 = vadd.f32 %v1144_v22, %v1592_v25  ;;  %v308_v31 = vadd.f32 %v306_v14, %v1592_v25  ;;  %v297_v35 = vadd.f32 %v295_v15, %v1592_v25 }
  0xd0   :  { %v1251_v28 = vpop.f32.mrf.mxu0  ;;  %v482_v43 = vadd.f32 %v480_v36, %v1592_v25  ;;  %v654_v47 = vadd.f32 %v652_v17, %v1592_v25  ;;  %v643_v59 = vadd.f32 %v641_v54, %v1592_v25 }
  0xd1   :  { %v138_v29 = vmul.f32 0.35355338, %v137_v26  ;;  %v145_v30 = vmul.f32 0.35355338, %v144_v27  ;;  %v309_v39 = vmul.f32 0.35355338, %v308_v31 }
  0xd2   :  { %v123_v32 = vpop.f32.mrf.mxu0  ;;  %v298_v42 = vmul.f32 0.35355338, %v297_v35  ;;  %v483_v49 = vmul.f32 0.35355338, %v482_v43  ;;  %v655_v52 = vmul.f32 0.35355338, %v654_v47 }
  0xd3   :  { %v1200_v33 = vpack.c.bf16 %v138_v29, %v138_v29  ;;  %v150_v34 = vmul.f32 %v145_v30, %v1554_v9  ;;  %v146_v41 = vmul.f32 %v145_v30, %v1534_v5  ;;  %v314_v45 = vmul.f32 %v312_v24, %v309_v39 }
  0xd4   :  { %v1252_v37 = vpop.f32.mrf.mxu0  ;;  %v1202_v48 = vpack.c.bf16 %v298_v42, %v298_v42  ;;  %v499_v53 = vmul.f32 %v497_v46, %v483_v49  ;;  %v487_v56 = vmul.f32 %v485_v16, %v483_v49  ;;  %v659_v57 = vmul.f32 %v657_v18, %v655_v52 }
  0xd5   :  { %163 = vrot.lane.b32.xlu0 %v1200_v33, %s1407_s21  ;;  %v1199_v38 = vpack.c.bf16 %v150_v34, %v150_v34  ;;  %v147_v44 = vpack.c.bf16 %v146_v41, %v146_v41  ;;  %v1201_v50 = vpack.c.bf16 %v314_v45, %v314_v45  ;;  %v644_v63 = vmul.f32 0.35355338, %v643_v59 }
  0xd6   :  { %v1205_v58 = vpack.c.bf16 %v499_v53, %v499_v53  ;;  %v1204_v60 = vpack.c.bf16 %v487_v56, %v487_v56  ;;  %v1207_v62 = vpack.c.bf16 %v659_v57, %v659_v57  ;;  %v671_v2 = vmul.f32 %v669_v61, %v655_v52 }
  0xd7   :  { %155 = vrot.lane.b32.xlu1 %v1199_v38, %s1406_s6  ;;  %149 = vst.msk [vmem:[#allocation2] sm:$0xf] %vm148_vm5, %v147_v44  ;;  %v1209_v4 = vpack.c.bf16 %v644_v63, %v644_v63  ;;  %v1155_v63 = vld [vmem:[%s1814_s28 + $0x4] sm:$0xf] }
  0xd8   :  { %v1208_v5 = vpack.c.bf16 %v671_v2, %v671_v2 }
  0xd9   :  { %340 = vrot.lane.b32.xlu0 %v1153_v40, %s1407_s21 }
  0xdb   :  { %324 = vrot.lane.b32.xlu1 %v1554_v9, %s1406_s6 }
  0xdd   :  { %333 = vrot.lane.b32.xlu0 %v1202_v48, %s1406_s6 }
  0xdf   :  { %319 = vrot.lane.b32.xlu1 %v1201_v50, %s1409_s22  ;;  %v234_v50 = vld [vmem:[%s1814_s28] sm:$0xf] }
  0xe1   :  { %512 = vrot.lane.b32.xlu0 %v1162_v51, %s1407_s21  ;;  %v240_v51 = vsel %vm238_vm8, %v234_v50, 0  ;;  %v1349_v50 = vld [vmem:[%s1794_s9] sm:$0xff]  }
  0xe3   :  { %468 = vrot.lane.b32.xlu1 %v1158_v55, %s1407_s21 }
  0xe5   :  { %504 = vrot.lane.b32.xlu0 %v1205_v58, %s1409_s22 }
  0xe7   :  { %492 = vrot.lane.b32.xlu1 %v1204_v60, %s1410_s24 }
  0xe9   :  { %664 = vrot.lane.b32.xlu0 %v1207_v62, %s1411_s7  ;;  %s1382_s7 = scalar_lea.vmem %s1133_s26, 128 }
  0xea   :  { %p1383_p0 = scmp.ne.s32.totalorder %s1133_s26, %s1382_s7  ;;  %p1388_p2 = scmp.lt.s32.totalorder %s1382_s7, %s1382_s7 }
  0xeb   :  { %690 = vrot.lane.b32.xlu1 %v1172_v0, %s1407_s21 }
  0xec   :  { %p1389_p3 = por %p1388_p2, %p1387_p1 }
  0xed   :  { %683 = vrot.lane.b32.xlu0 %v1209_v4, %s1409_s22  ;;  %v408_v4 = vsel %vm238_vm8, %v1155_v63, 0  ;;  %v1177_v63 = vld [vmem:[%s1795_s10] ss:$0 sm:$0xff] }
  0xee   :  { %p1390_p4 = pnand %p1389_p3, %p1383_p0 }
  0xef   :  { %676 = vrot.lane.b32.xlu1 %v1208_v5, %s1410_s24 }
 0x147   :  { %v164_v6 = vpop.permute.xlu0 %163 }
 0x149   :  { %v156_v7 = vpop.permute.xlu1 %155 }
 0x14a   :  { %159 = vst.msk [vmem:[#allocation2] sm:$0xf] %vm158_vm6, %v156_v7 }
 0x14b   :  { %167 = vst.msk [vmem:[#allocation2] sm:$0xf] %vm166_vm3, %v164_v6  ;;  %v341_v8 = vpop.permute.xlu0 %340 }
 0x14c   :  { %343 = vst.msk [vmem:[#allocation3] sm:$0xf] %vm166_vm3, %v341_v8  ;;  %v1164_v8 = vld [vmem:[%s1814_s28 + $0x8] sm:$0xf] }
 0x14d   :  { %v325_v9 = vpop.permute.xlu1 %324 }
 0x14e   :  { %v327_v10 = vmul.f32 %v325_v9, %v309_v39 }
 0x14f   :  { %v334_v11 = vpop.permute.xlu0 %333 }
 0x150   :  { %v328_v13 = vpack.c.bf16 %v327_v10, %v327_v10 }
 0x151   :  { %v320_v12 = vpop.permute.xlu1 %319 }
 0x152   :  { %v174_v14 = vld [vmem:[#allocation2] sm:$0xf] }
 0x153   :  { %322 = vst.msk [vmem:[#allocation2] sm:$0xf] %vm148_vm5, %v320_v12  ;;  %1256 = vmatmul.mubr.msk.bf16.vlgmr.msra.gmra.mxu0 %vm176_vm4, %v174_v14  ;;  %v513_v15 = vpop.permute.xlu0 %512  ;;  %v345_v16 = vld [vmem:[#allocation3] sm:$0xf]  ;;  %v580_v12 = vsel %vm238_vm8, %v1164_v8, 0 }
 0x154   :  { %329 = vst.msk [vmem:[#allocation2] sm:$0xf] %vm158_vm6, %v328_v13  ;;  %v350_v17 = vsel %vm176_vm4, %v345_v16, 0  ;;  %1261 = vmatprep.mubr.msk.bf16.mxu0 %vm1405_vm0, %v1404_v1  ;;  %1260 = vmatpush3.bf16.msra.mxu0 %v240_v51  ;;  %v1174_v16 = vld [vmem:[%s1814_s28 + $0xc] sm:$0xf] }
 0x155   :  { %515 = vst.msk [vmem:[#allocation3] sm:$0xf] %vm166_vm3, %v513_v15  ;;  %336 = vst.msk [vmem:[#allocation2] sm:$0xf] %vm166_vm3, %v334_v11  ;;  %v469_v18 = vpop.permute.xlu1 %468  ;;  %1266 = vmatpush3.bf16.xpose.msra.mxu1 %v350_v17  ;;  %1271 = vmatprep.subr.bf16.mxu0 %v1404_v1 }
 0x156   :  { %v471_v19 = vadd.f32 %v469_v18, %v1592_v25  ;;  %1277 = vmatprep.subr.bf16.mxu1 %v1404_v1 }
 0x157   :  { %v505_v23 = vpop.permute.xlu0 %504 }
 0x158   :  { %v472_v20 = vmul.f32 0.35355338, %v471_v19 }
 0x159   :  { %v493_v21 = vpop.permute.xlu1 %492 }
 0x15a   :  { %v473_v27 = vpack.c.bf16 %v472_v20, %v472_v20  ;;  %v758_v20 = vsel %vm238_vm8, %v1174_v16, 0  ;;  %v1353_v16 = vld [vmem:[%s1800_s15 + $0x30] sm:$0xff]  }
 0x15b   :  { %v665_v25 = vpop.permute.xlu0 %664 }
 0x15c   :  { %v517_v22 = vld [vmem:[#allocation3] sm:$0xf]  ;;  %v344_v24 = vld [vmem:[#allocation2] sm:$0xf] }
 0x15d   :  { %v522_v26 = vsel %vm176_vm4, %v517_v22, 0  ;;  %495 = vst.msk [vmem:[#allocation2] sm:$0xf] %vm148_vm5, %v493_v21  ;;  %v691_v28 = vpop.permute.xlu1 %690  ;;  %1268 = vmatmul.mubr.msk.bf16.vlgmr.msra.gmra.mxu1 %vm176_vm4, %v344_v24 }
 0x15e   :  { %507 = vst.msk [vmem:[#allocation2] sm:$0xf] %vm158_vm6, %v505_v23  ;;  %1278 = vmatpush3.bf16.xpose.msra.mxu1 %v522_v26  ;;  %1279 = vmatprep.mubr.msk.bf16.mxu1 %vm1405_vm0, %v1404_v1 }
 0x15f   :  { %693 = vst.msk [vmem:[#allocation3] sm:$0xf] %vm166_vm3, %v691_v28  ;;  %508 = vst.msk [vmem:[#allocation2] sm:$0xf] %vm166_vm3, %v473_v27  ;;  %1289 = vmatprep.subr.bf16.mxu1 %v1404_v1  ;;  %v684_v33 = vpop.permute.xlu0 %683 }
 0x161   :  { %v677_v32 = vpop.permute.xlu1 %676 }
 0x166   :  { %v695_v29 = vld [vmem:[#allocation3] sm:$0xf]  ;;  %v516_v30 = vld [vmem:[#allocation2] sm:$0xf] }
 0x167   :  { %v700_v31 = vsel %vm176_vm4, %v695_v29, 0  ;;  %1280 = vmatmul.mubr.msk.bf16.vlgmr.msra.gmra.mxu1 %vm176_vm4, %v516_v30  ;;  %667 = vst.msk [vmem:[#allocation2] sm:$0xf] %vm148_vm5, %v665_v25 }
 0x168   :  { %679 = vst.msk [vmem:[#allocation2] sm:$0xf] %vm158_vm6, %v677_v32  ;;  %1290 = vmatpush3.bf16.xpose.msra.mxu1 %v700_v31  ;;  %1291 = vmatprep.mubr.msk.bf16.mxu1 %vm1405_vm0, %v1404_v1 }
 0x169   :  { %686 = vst.msk [vmem:[#allocation2] sm:$0xf] %vm166_vm3, %v684_v33  ;;  %1301 = vmatprep.subr.bf16.mxu1 %v1404_v1 }
 0x170   :  { %v694_v34 = vld [vmem:[#allocation2] sm:$0xf] }
 0x171   :  { %1292 = vmatmul.mubr.msk.bf16.vlgmr.msra.gmra.mxu1 %vm176_vm4, %v694_v34 }
 0x172   :  { %1305 = vmatprep.mubr.msk.bf16.mxu1 %vm1405_vm0, %v1404_v1 }
 0x213   :  { %v217_v35 = vpop.f32.mrf.mxu0 }
 0x214   :  { %v224_v36 = vsel %vm223_vm7, %v217_v35, -inf }
 0x215   :  { %225 = vmax.xlane.f32.xlu1 %v224_v36  ;;  %v1257_v37 = vpop.f32.mrf.mxu0 }
 0x217   :  { %v220_v38 = vpop.f32.mrf.mxu0 }
 0x219   :  { %v1258_v39 = vpop.f32.mrf.mxu0 }
 0x21d   :  { %v386_v40 = vpop.f32.mrf.mxu1 }
 0x21e   :  { %v392_v41 = vsel %vm223_vm7, %v386_v40, -inf }
 0x21f   :  { %393 = vmax.xlane.f32.xlu0 %v392_v41  ;;  %v1269_v42 = vpop.f32.mrf.mxu1 }
 0x221   :  { %v389_v43 = vpop.f32.mrf.mxu1 }
 0x223   :  { %v1270_v44 = vpop.f32.mrf.mxu1 }
 0x227   :  { %v558_v45 = vpop.f32.mrf.mxu1 }
 0x228   :  { %v564_v46 = vsel %vm223_vm7, %v558_v45, -inf }
 0x229   :  { %565 = vmax.xlane.f32.xlu0 %v564_v46  ;;  %v1281_v47 = vpop.f32.mrf.mxu1 }
 0x22a   :  { %v1348_v47 = vld [vmem:[%s1794_s9 + $0x8] sm:$0xff]  }
 0x22b   :  { %v561_v48 = vpop.f32.mrf.mxu1  ;;  %1302 = vmatpush3.bf16.msra.mxu1 %v1348_v47 }
 0x22c   :  { %1303 = vmatprep.subr.bf16.mxu1 %v1404_v1 }
 0x22d   :  { %v1282_v49 = vpop.f32.mrf.mxu1 }
 0x22f   :  { %1304 = vmatpush3.bf16.msra.mxu1 %v1349_v50 }
 0x230   :  { %1317 = vmatprep.subr.bf16.mxu1 %v1404_v1 }
 0x231   :  { %v736_v52 = vpop.f32.mrf.mxu1 }
 0x232   :  { %v742_v53 = vsel %vm223_vm7, %v736_v52, -inf }
 0x233   :  { %v1293_v54 = vpop.f32.mrf.mxu1  ;;  %743 = vmax.xlane.f32.xlu1 %v742_v53 }
 0x235   :  { %v739_v55 = vpop.f32.mrf.mxu1 }
 0x237   :  { %v1294_v56 = vpop.f32.mrf.mxu1 }
 0x29e   :  { %v226_v57 = vpop.xlane.xlu1 %225 }
 0x29f   :  { %v227_v58 = vsub.f32 %v217_v35, %v226_v57 }
 0x2a1   :  { %v228_v59 = vmul.f32 1.442695, %v227_v58 }
 0x2a3   :  { %1360 = vpow2.f32 %v228_v59 }
 0x2a8   :  { %v394_v60 = vpop.xlane.xlu0 %393 }
 0x2a9   :  { %v395_v61 = vsub.f32 %v386_v40, %v394_v60 }
 0x2ab   :  { %v396_v62 = vmul.f32 1.442695, %v395_v61 }
 0x2ad   :  { %1362 = vpow2.f32 %v396_v62 }
 0x2b0   :  { %v1361_v0 = vpop.eup %1360 }
 0x2b1   :  { %v233_v2 = vpack.c.bf16 %v1361_v0, %v1361_v0  ;;  %v230_v21 = vsel %vm223_vm7, %v1361_v0, 0.0 }
 0x2b2   :  { %v566_v5 = vpop.xlane.xlu0 %565 }
 0x2b3   :  { %v567_v6 = vsub.f32 %v558_v45, %v566_v5  ;;  %1262 = vmatmul.mubr.msk.bf16.vlgmr.msra.gmra.mxu0 %vm223_vm7, %v233_v2 }
 0x2b4   :  { %1272 = vmatpush3.bf16.msra.mxu0 %v408_v4  ;;  %1273 = vmatprep.mubr.msk.bf16.mxu0 %vm1405_vm0, %v1404_v1 }
 0x2b5   :  { %v568_v7 = vmul.f32 1.442695, %v567_v6  ;;  %1283 = vmatprep.subr.bf16.mxu0 %v1404_v1 }
 0x2b7   :  { %1364 = vpow2.f32 %v568_v7 }
 0x2ba   :  { %v1363_v9 = vpop.eup %1362 }
 0x2bb   :  { %v398_v10 = vsel %vm223_vm7, %v1363_v9, 0.0  ;;  %v401_v11 = vpack.c.bf16 %v1363_v9, %v1363_v9 }
 0x2bc   :  { %399 = vadd.xlane.f32.xlu0 %v398_v10  ;;  %v744_v13 = vpop.xlane.xlu1 %743 }
 0x2bd   :  { %v745_v14 = vsub.f32 %v736_v52, %v744_v13  ;;  %1274 = vmatmul.mubr.msk.bf16.vlgmr.msra.gmra.mxu0 %vm223_vm7, %v401_v11 }
 0x2be   :  { %1284 = vmatpush3.bf16.msra.mxu0 %v580_v12  ;;  %1285 = vmatprep.mubr.msk.bf16.mxu0 %vm1405_vm0, %v1404_v1 }
 0x2bf   :  { %v746_v15 = vmul.f32 1.442695, %v745_v14  ;;  %1295 = vmatprep.subr.bf16.mxu0 %v1404_v1  ;;  %v1350_v14 = vld [vmem:[%s1798_s13 + $0x8] sm:$0xff]  }
 0x2c1   :  { %1366 = vpow2.f32 %v746_v15  ;;  %v1352_v15 = vld [vmem:[%s1800_s15 + $0x38] sm:$0xff]  }
 0x2c4   :  { %v1365_v17 = vpop.eup %1364 }
 0x2c5   :  { %v570_v18 = vsel %vm223_vm7, %v1365_v17, 0.0  ;;  %v573_v19 = vpack.c.bf16 %v1365_v17, %v1365_v17 }
 0x2c6   :  { %571 = vadd.xlane.f32.xlu1 %v570_v18 }
 0x2c7   :  { %1286 = vmatmul.mubr.msk.bf16.vlgmr.msra.gmra.mxu0 %vm223_vm7, %v573_v19 }
 0x2c8   :  { %1296 = vmatpush3.bf16.msra.mxu0 %v758_v20  ;;  %1297 = vmatprep.mubr.msk.bf16.mxu0 %vm1405_vm0, %v1404_v1 }
 0x2c9   :  { %1309 = vmatprep.subr.bf16.mxu0 %v1404_v1 }
 0x2ca   :  { %231 = vadd.xlane.f32.xlu1 %v230_v21  ;;  %v1181_v21 = vld [vmem:[%s1796_s11] ss:$0 sm:$0xff] }
 0x2ce   :  { %v1367_v22 = vpop.eup %1366 }
 0x2cf   :  { %v748_v23 = vsel %vm223_vm7, %v1367_v22, 0.0  ;;  %v751_v24 = vpack.c.bf16 %v1367_v22, %v1367_v22 }
 0x2d0   :  { %749 = vadd.xlane.f32.xlu0 %v748_v23  ;;  %v1182_v23 = vld [vmem:[%s1797_s12] ss:$0 sm:$0xff] }
 0x2d1   :  { %1298 = vmatmul.mubr.msk.bf16.vlgmr.msra.gmra.mxu0 %vm223_vm7, %v751_v24 }
 0x2d2   :  { %1313 = vmatprep.mubr.msk.bf16.mxu0 %vm1405_vm0, %v1404_v1  ;;  %1310 = vmatpush3.bf16.msra.mxu0 %v1350_v14 }
 0x2d3   :  { %1311 = vmatprep.subr.bf16.mxu0 %v1404_v1 }
 0x345   :  { %v400_v28 = vpop.xlane.xlu0 %399 }
 0x34f   :  { %v572_v26 = vpop.xlane.xlu1 %571 }
 0x353   :  { %v232_v27 = vpop.xlane.xlu1 %231 }
 0x354   :  { %1368 = vrcp.f32 %v232_v27 }
 0x355   :  { %1370 = vrcp.f32 %v400_v28  ;;  %v1354_v28 = vld [vmem:[%s1800_s15 + $0x28] sm:$0xff]  }
 0x356   :  { %1372 = vrcp.f32 %v572_v26 }
 0x359   :  { %v750_v40 = vpop.xlane.xlu0 %749 }
 0x35a   :  { %1374 = vrcp.f32 %v750_v40 }
 0x361   :  { %v1369_v25 = vpop.eup %1368 }
 0x362   :  { %v1371_v35 = vpop.eup %1370 }
 0x363   :  { %v1373_v43 = vpop.eup %1372 }
 0x367   :  { %v1375_v52 = vpop.eup %1374 }
 0x373   :  { %v276_v29 = vpop.f32.mrf.mxu0 }
 0x374   :  { %v284_v30 = vmul.f32 %v1369_v25, %v276_v29  ;;  %v1355_v25 = vld [vmem:[%s1800_s15 + $0x20] sm:$0xff]   ;;  %v1356_v29 = vld [vmem:[%s1800_s15 + $0x18] sm:$0xff]  }
 0x375   :  { %v1263_v31 = vpop.f32.mrf.mxu0 }
 0x376   :  { %v285_v32 = vpack.c.bf16 %v284_v30, %v284_v30  ;;  %v1357_v30 = vld [vmem:[%s1800_s15 + $0x10] sm:$0xff]   ;;  %v1358_v31 = vld [vmem:[%s1800_s15 + $0x8] sm:$0xff]  }
 0x377   :  { %v279_v33 = vpop.f32.mrf.mxu0 }
 0x378   :  { %286 = vst.msk [vmem:[#allocation4] sm:$0xf] %vm148_vm5, %v285_v32  ;;  %v1359_v32 = vld [vmem:[%s1800_s15] sm:$0xff]  }
 0x379   :  { %v1264_v34 = vpop.f32.mrf.mxu0  ;;  %v1183_v33 = vld [vmem:[%s1799_s14] ss:$0 sm:$0xff] }
 0x37d   :  { %v444_v36 = vpop.f32.mrf.mxu0 }
 0x37e   :  { %v452_v37 = vmul.f32 %v1371_v35, %v444_v36 }
 0x37f   :  { %v1275_v38 = vpop.f32.mrf.mxu0 }
 0x380   :  { %v1203_v39 = vpack.c.bf16 %v452_v37, %v452_v37 }
 0x381   :  { %v447_v41 = vpop.f32.mrf.mxu0 }
 0x382   :  { %457 = vrot.lane.b32.xlu0 %v1203_v39, %s1406_s6 }
 0x383   :  { %v1276_v42 = vpop.f32.mrf.mxu0 }
 0x387   :  { %v616_v44 = vpop.f32.mrf.mxu0 }
 0x388   :  { %v624_v45 = vmul.f32 %v1373_v43, %v616_v44  ;;  %v1188_v44 = vld [vmem:[%s1801_s16] ss:$0 sm:$0xff] }
 0x389   :  { %v1287_v46 = vpop.f32.mrf.mxu0 }
 0x38a   :  { %v1206_v48 = vpack.c.bf16 %v624_v45, %v624_v45 }
 0x38b   :  { %v619_v49 = vpop.f32.mrf.mxu0 }
 0x38c   :  { %629 = vrot.lane.b32.xlu1 %v1206_v48, %s1407_s21 }
 0x38d   :  { %v1288_v51 = vpop.f32.mrf.mxu0 }
 0x391   :  { %v794_v53 = vpop.f32.mrf.mxu0 }
 0x392   :  { %v802_v54 = vmul.f32 %v1375_v52, %v794_v53 }
 0x393   :  { %v1299_v55 = vpop.f32.mrf.mxu0 }
 0x394   :  { %v1210_v56 = vpack.c.bf16 %v802_v54, %v802_v54 }
 0x395   :  { %v797_v57 = vpop.f32.mrf.mxu0 }
 0x396   :  { %807 = vrot.lane.b32.xlu1 %v1210_v56, %s1408_s23 }
 0x397   :  { %v1300_v58 = vpop.f32.mrf.mxu0 }
 0x3f4   :  { %v458_v59 = vpop.permute.xlu0 %457 }
 0x3f5   :  { %460 = vst.msk [vmem:[#allocation4] sm:$0xf] %vm158_vm6, %v458_v59 }
 0x3fe   :  { %v630_v60 = vpop.permute.xlu1 %629 }
 0x3ff   :  { %632 = vst.msk [vmem:[#allocation4] sm:$0xf] %vm166_vm3, %v630_v60 }
 0x408   :  { %v808_v61 = vpop.permute.xlu1 %807 }
 0x409   :  { %811 = vst.msk [vmem:[#allocation4] sm:$0xf] %vm810_vm9, %v808_v61  ;;  %v1197_v61 = vld [vmem:[%s1802_s17] ss:$0 sm:$0xff] }
 0x410   :  { %v812_v62 = vld [vmem:[#allocation4] sm:$0xf] }
 0x411   :  { %1306 = vmatmul.mubr.msk.bf16.vlgmr.msra.gmra.mxu1 %vm82_vm1, %v812_v62 }
 0x412   :  { %1333 = vmatprep.mubr.msk.bf16.mxu1 %vm1405_vm0, %v1404_v1  ;;  %1318 = vmatpush3.bf16.msra.mxu1 %v1352_v15 }
 0x413   :  { %1319 = vmatprep.subr.bf16.mxu1 %v1404_v1 }
 0x416   :  { %1320 = vmatpush3.bf16.msra.mxu1 %v1353_v16 }
 0x417   :  { %1321 = vmatprep.subr.bf16.mxu1 %v1404_v1 }
 0x41a   :  { %1322 = vmatpush3.bf16.msra.mxu1 %v1354_v28 }
 0x41b   :  { %1323 = vmatprep.subr.bf16.mxu1 %v1404_v1 }
 0x41e   :  { %1324 = vmatpush3.bf16.msra.mxu1 %v1355_v25 }
 0x41f   :  { %1325 = vmatprep.subr.bf16.mxu1 %v1404_v1 }
 0x422   :  { %1326 = vmatpush3.bf16.msra.mxu1 %v1356_v29 }
 0x423   :  { %1327 = vmatprep.subr.bf16.mxu1 %v1404_v1 }
 0x426   :  { %1328 = vmatpush3.bf16.msra.mxu1 %v1357_v30 }
 0x427   :  { %1329 = vmatprep.subr.bf16.mxu1 %v1404_v1 }
 0x42a   :  { %1330 = vmatpush3.bf16.msra.mxu1 %v1358_v31 }
 0x42b   :  { %1331 = vmatprep.subr.bf16.mxu1 %v1404_v1 }
 0x42e   :  { %1332 = vmatpush3.bf16.msra.mxu1 %v1359_v32 }
 0x4d1   :  { %v873_v0 = vpop.f32.mrf.mxu1 }
 0x4d2   :  { %v874_v2 = vadd.f32 %v1177_v63, %v873_v0  ;;  %v1198_v63 = vld [vmem:[%s1803_s18] ss:$0 sm:$0xff] }
 0x4d3   :  { %v1307_v4 = vpop.f32.mrf.mxu1 }
 0x4d4   :  { %v879_v5 = vadd.f32 %v874_v2, %v1526_v3  ;;  %v1351_v3 = vld [vmem:[%s1798_s13] sm:$0xff]  }
 0x4d5   :  { %v876_v6 = vpop.f32.mrf.mxu1  ;;  %1312 = vmatpush3.bf16.msra.mxu0 %v1351_v3 }
 0x4d6   :  { %v882_v7 = vsel %vm82_vm1, %v879_v5, 0.0 }
 0x4d7   :  { %883 = vadd.xlane.f32.xlu0 %v882_v7  ;;  %v1308_v8 = vpop.f32.mrf.mxu1 }
 0x560   :  { %v884_v9 = vpop.xlane.xlu0 %883 }
 0x561   :  { %v886_v10 = vmul.f32 0.03125, %v884_v9 }
 0x563   :  { %v887_v11 = vsub.f32 %v879_v5, %v886_v10 }
 0x565   :  { %v888_v12 = vmul.f32 %v887_v11, %v887_v11 }
 0x567   :  { %v889_v13 = vsel %vm82_vm1, %v888_v12, 0.0 }
 0x568   :  { %890 = vadd.xlane.f32.xlu1 %v889_v13 }
 0x5f1   :  { %v891_v17 = vpop.xlane.xlu1 %890 }
 0x5f2   :  { %v892_v18 = vmul.f32 0.03125, %v891_v17 }
 0x5f4   :  { %v893_v19 = vadd.f32 1e-05, %v892_v18 }
 0x5f6   :  { %1376 = vrsqrt.f32 %v893_v19 }
 0x603   :  { %v1377_v20 = vpop.eup %1376 }
 0x604   :  { %v895_v22 = vmul.f32 %v1377_v20, %v887_v11 }
 0x606   :  { %v902_v24 = vmul.f32 %v1181_v21, %v895_v22 }
 0x608   :  { %v909_v26 = vadd.f32 %v1182_v23, %v902_v24 }
 0x60a   :  { %v910_v27 = vpack.c.bf16 %v909_v26, %v909_v26 }
 0x60c   :  { %1314 = vmatmul.mubr.msk.bf16.vlgmr.msra.gmra.mxu0 %vm82_vm1, %v910_v27 }
 0x6cc   :  { %v971_v34 = vpop.f32.mrf.mxu0 }
 0x6cd   :  { %v972_v35 = vadd.f32 %v1183_v33, %v971_v34 }
 0x6ce   :  { %v1315_v36 = vpop.f32.mrf.mxu0 }
 0x6cf   :  { %v978_v37 = vmin.f32 %v972_v35, 0.0  ;;  %vm977_vm10 = vcmp.gt.f32.partialorder %v972_v35, 0.0 }
 0x6d0   :  { %v974_v38 = vpop.f32.mrf.mxu0 }
 0x6d1   :  { %v979_v39 = vmul.f32 1.442695, %v978_v37 }
 0x6d2   :  { %v1316_v40 = vpop.f32.mrf.mxu0 }
 0x6d3   :  { %1378 = vpow2.f32 %v979_v39 }
 0x6e0   :  { %v1379_v41 = vpop.eup %1378 }
 0x6e1   :  { %v1187_v42 = vadd.f32 -1.0, %v1379_v41 }
 0x6e3   :  { %v982_v1 = vsel %vm977_vm10, %v972_v35, %v1187_v42 }
 0x6e4   :  { %v983_v43 = vpack.c.bf16 %v982_v1, %v982_v1 }
 0x6e6   :  { %1334 = vmatmul.mubr.bf16.vlgmr.msra.gmra.mxu1 %v983_v43 }
 0x7a6   :  { %v1089_v45 = vpop.f32.mrf.mxu1 }
 0x7a7   :  { %v1090_v46 = vadd.f32 %v1188_v44, %v1089_v45 }
 0x7a8   :  { %v1335_v47 = vpop.f32.mrf.mxu1 }
 0x7a9   :  { %v1095_v48 = vadd.f32 %v1090_v46, %v909_v26 }
 0x7aa   :  { %v1092_v49 = vpop.f32.mrf.mxu1 }
 0x7ab   :  { %v1098_v50 = vsel %vm82_vm1, %v1095_v48, 0.0 }
 0x7ac   :  { %1099 = vadd.xlane.f32.xlu0 %v1098_v50  ;;  %v1336_v51 = vpop.f32.mrf.mxu1 }
 0x835   :  { %v1100_v52 = vpop.xlane.xlu0 %1099 }
 0x836   :  { %v1101_v53 = vmul.f32 0.03125, %v1100_v52 }
 0x838   :  { %v1102_v54 = vsub.f32 %v1095_v48, %v1101_v53 }
 0x83a   :  { %v1103_v55 = vmul.f32 %v1102_v54, %v1102_v54 }
 0x83c   :  { %v1104_v56 = vsel %vm82_vm1, %v1103_v55, 0.0 }
 0x83d   :  { %1105 = vadd.xlane.f32.xlu0 %v1104_v56 }
 0x8c6   :  { %v1106_v57 = vpop.xlane.xlu0 %1105 }
 0x8c7   :  { %v1107_v58 = vmul.f32 0.03125, %v1106_v57 }
 0x8c9   :  { %v1108_v59 = vadd.f32 1e-05, %v1107_v58 }
 0x8cb   :  { %1380 = vrsqrt.f32 %v1108_v59 }
 0x8d8   :  { %v1381_v60 = vpop.eup %1380 }
 0x8d9   :  { %v1110_v62 = vmul.f32 %v1381_v60, %v1102_v54 }
 0x8db   :  { %v1117_v0 = vmul.f32 %v1197_v61, %v1110_v62 }
 0x8dd   :  { %v1124_v2 = vadd.f32 %v1198_v63, %v1117_v0 }
 0x8df   :  { %1125 = vst.msk [vmem:[#allocation5] sm:$0xff] %vm82_vm1, %v1124_v2 }
 0x8e0   :  { %1393 = shalt.err (!%p1390_p4)
}
 0x8e1   :  { %1135 = dma.vmem_to_hbm [thread:$0]  %s1133_s26, 128, %s1804_s19, [#allocation6]  }
 0x8e2   :  { %1402 = dma.done.wait [#allocation6], 128  }
 0x8e3   :  { %1403 = vsyncadd [#allocation6], 4294967168 }
 0x8e4   :  { %1139 = vsyncpa [#allocation6], 1 }

</bundles_post_ra>
